<compile_context>
chip_gen: v5e
topology: v5e:2x2
jax: 0.10.0
libtpu: 0.0.40
codegen_flags: <defaults>
</compile_context>

<pallas_src>
import functools
import math

import jax
import jax.numpy as jnp
from jax.experimental import pallas as pl
from jax.experimental.pallas import tpu as pltpu


def _round_up(x, m):
    return (x + m - 1) // m * m


def _pick_time_chunk(S, target=32):
    """Largest divisor of S that is <= target (S itself if S <= target)."""
    if S <= target:
        return S
    best = 1
    for t in range(1, target + 1):
        if S % t == 0:
            best = t
    return best


def lstm_kernel(x_ref, *refs, num_layers):
    # refs = [wih_0, whh_0, b_0, ..., wih_{L-1}, whh_{L-1}, b_{L-1},
    #         fc_w, fc_b,                           (params)
    #         out_ref,                              (output)
    #         gx_scr, seq_scr, h_scr, c_scr]        (VMEM scratch)
    n_params = 3 * num_layers + 2
    param_refs = refs[:n_params]
    out_ref = refs[n_params]
    gx_scr, seq_scr, h_scr, c_scr = refs[n_params + 1:]

    S, TB, Dp = x_ref.shape
    Hp = h_scr.shape[-1]
    Tc = gx_scr.shape[0] // TB          # timesteps per projection chunk
    n_chunks = S // Tc

    fc_w_ref = param_refs[3 * num_layers]      # (Hp, Cp)  bf16
    fc_b_ref = param_refs[3 * num_layers + 1]  # (1,  Cp)  f32

    for layer in range(num_layers):
        wih = param_refs[3 * layer][...]        # (Din_p, 4Hp) bf16
        whh = param_refs[3 * layer + 1][...]    # (Hp,    4Hp) bf16
        bias = param_refs[3 * layer + 2][...]   # (1,     4Hp) f32

        # zero initial hidden / cell state (matches the PyTorch forward)
        h_scr[...] = jnp.zeros(h_scr.shape, jnp.float32)
        c_scr[...] = jnp.zeros(c_scr.shape, jnp.float32)

        is_first = layer == 0
        is_last = layer == num_layers - 1

        @pl.loop(0, n_chunks)
        def _(chunk, wih=wih, whh=whh, bias=bias,
              is_first=is_first, is_last=is_last):
            t0 = pl.multiple_of(chunk * Tc, Tc)
            row0 = pl.multiple_of(chunk * (Tc * TB), Tc * TB)

            # ---- chunked input projection: Tc timesteps in one MXU matmul --
            if is_first:
                x_in = x_ref[pl.ds(t0, Tc), :, :].reshape(Tc * TB, Dp)  # bf16
            else:
                x_in = seq_scr[pl.ds(row0, Tc * TB), :]                 # bf16
            gx_scr[...] = (
                jnp.dot(x_in, wih, preferred_element_type=jnp.float32) + bias
            )                                              # (Tc*TB, 4Hp) f32

            # ---- recurrence over the chunk ---------------------------------
            @pl.loop(0, Tc)
            def _(tt):
                row = pl.multiple_of(tt * TB, TB)
                h = h_scr[...]                             # (TB, Hp) f32
                c = c_scr[...]                             # (TB, Hp) f32

                # only the small recurrent matmul remains per step
                gates = gx_scr[pl.ds(row, TB), :] + jnp.dot(
                    h.astype(jnp.bfloat16), whh,
                    preferred_element_type=jnp.float32)    # (TB, 4Hp) f32

                # gate order [i, f, o, g]: one bulk sigmoid (via tanh, single
                # EUP push per element) + one bulk tanh
                sig = 0.5 * jnp.tanh(0.5 * gates[:, : 3 * Hp]) + 0.5
                g_g = jnp.tanh(gates[:, 3 * Hp:])
                i_g = sig[:, :Hp]
                f_g = sig[:, Hp:2 * Hp]
                o_g = sig[:, 2 * Hp:3 * Hp]

                c_new = f_g * c + i_g * g_g
                h_new = o_g * jnp.tanh(c_new)

                h_scr[...] = h_new
                c_scr[...] = c_new
                if not is_last:  # final layer only needs the last h
                    seq_scr[pl.ds(pl.multiple_of(row0 + row, TB), TB), :] = (
                        h_new.astype(jnp.bfloat16))

    # decode the hidden state of the last time step of the last layer
    out_ref[...] = (
        jnp.dot(h_scr[...].astype(jnp.bfloat16), fc_w_ref[...],
                preferred_element_type=jnp.float32)
        + fc_b_ref[...]
    ).astype(out_ref.dtype)


def _pack_gate_matrix(w, d_in, H, d_pad, Hp):
    """(d_in, 4H) gate order [i,f,g,o] -> zero-padded (d_pad, 4Hp), order [i,f,o,g]."""
    out = jnp.zeros((d_pad, 4 * Hp), jnp.float32)
    for dst, src in enumerate((0, 1, 3, 2)):
        out = out.at[:d_in, dst * Hp:dst * Hp + H].set(w[:, src * H:(src + 1) * H])
    return out


def _pack_gate_bias(b, H, Hp):
    out = jnp.zeros((1, 4 * Hp), jnp.float32)
    for dst, src in enumerate((0, 1, 3, 2)):
        out = out.at[:, dst * Hp:dst * Hp + H].set(b[:, src * H:(src + 1) * H])
    return out


def lstm_forward(x, params, *, hidden_size, num_layers, num_classes,
                 block_batch=128, time_chunk=32):
    """x: (batch, seq_len, input_size) float32. Returns (batch, num_classes)."""
    B, S, D = x.shape
    H = hidden_size

    # ---- lane / sublane padding -------------------------------------------
    Hp = _round_up(H, 128)
    Dp = _round_up(D, 128)
    Cp = _round_up(num_classes, 128)

    # Batch tiling: guarantee >=2 grid blocks when B > 8 so the "parallel"
    # axis can be split across both TensorCores (v7x megacore).
    if B <= block_batch:
        TB = _round_up((B + 1) // 2, 8) if B > 8 else _round_up(max(B, 1), 8)
    else:
        TB = block_batch
    Bp = _round_up(B, TB)
    n_blocks = Bp // TB

    Tc = _pick_time_chunk(S, time_chunk)

    # ---- pack weights: reorder gates to [i,f,o,g], pad, bf16 cast ----------
    flat_params = []
    for layer in range(num_layers):
        wih_t, whh_t, b = params["layers"][layer]   # (Din,4H), (H,4H), (1,4H)
        d_in = wih_t.shape[0]
        d_in_pad = Dp if layer == 0 else Hp
        flat_params.append(
            _pack_gate_matrix(wih_t, d_in, H, d_in_pad, Hp).astype(jnp.bfloat16))
        flat_params.append(
            _pack_gate_matrix(whh_t, H, H, Hp, Hp).astype(jnp.bfloat16))
        flat_params.append(_pack_gate_bias(b, H, Hp))            # f32
    fc_w = jnp.zeros((Hp, Cp), jnp.float32).at[:H, :num_classes].set(
        params["fc_w_t"]).astype(jnp.bfloat16)
    fc_b = jnp.zeros((1, Cp), jnp.float32).at[:, :num_classes].set(params["fc_b"])
    flat_params.append(fc_w)
    flat_params.append(fc_b)

    # ---- input: bf16 host cast, pad, regroup so every grid block is one
    #      contiguous HBM region: (Bp//TB, S, TB, Dp) -------------------------
    x_pad = jnp.zeros((Bp, S, Dp), jnp.bfloat16).at[:B, :, :D].set(
        x.astype(jnp.bfloat16))
    x_blk = jnp.transpose(x_pad.reshape(n_blocks, TB, S, Dp), (0, 2, 1, 3))

    kernel = functools.partial(lstm_kernel, num_layers=num_layers)

    seq_rows = S * TB if num_layers > 1 else 8   # unused when num_layers == 1

    # ---- VMEM budget (blocks double-buffered by the pipeline; scratch not) -
    param_bytes = sum(int(p.size) * p.dtype.itemsize for p in flat_params)
    footprint = (
        2 * S * TB * Dp * 2          # x block (bf16, double-buffered)
        + 2 * param_bytes            # weights / biases (pipeline may 2x them)
        + 2 * TB * Cp * 4            # output block
        + Tc * TB * 4 * Hp * 4       # gx scratch (time-chunked projection)
        + seq_rows * Hp * 2          # inter-layer hidden sequence (bf16)
        + 2 * TB * Hp * 4            # h, c state
    )
    try:
        vmem_cap = int(pltpu.get_tpu_info().vmem_capacity_bytes)
    except Exception:
        vmem_cap = 64 << 20          # conservative fallback (v7x per-TC VMEM)
    vmem_limit = min(max(int(1.5 * footprint) + (4 << 20), 16 << 20),
                     int(0.9 * vmem_cap))

    weight_specs = [pl.BlockSpec(p.shape, lambda i: (0, 0)) for p in flat_params]

    out = pl.pallas_call(
        kernel,
        out_shape=jax.ShapeDtypeStruct((Bp, Cp), jnp.float32),
        grid_spec=pltpu.PrefetchScalarGridSpec(
            num_scalar_prefetch=0,
            grid=(n_blocks,),
            in_specs=[pl.BlockSpec((None, S, TB, Dp), lambda i: (i, 0, 0, 0))]
                     + weight_specs,
            out_specs=pl.BlockSpec((TB, Cp), lambda i: (i, 0)),
            scratch_shapes=[
                pltpu.VMEM((Tc * TB, 4 * Hp), jnp.float32),   # gx (chunked proj)
                pltpu.VMEM((seq_rows, Hp), jnp.bfloat16),     # inter-layer seq
                pltpu.VMEM((TB, Hp), jnp.float32),            # h state
                pltpu.VMEM((TB, Hp), jnp.float32),            # c state
            ],
        ),
        compiler_params=pltpu.CompilerParams(
            dimension_semantics=("parallel",),
            vmem_limit_bytes=vmem_limit,
        ),
    )(x_blk, *flat_params)

    return out[:B, :num_classes]


def init_params(key, input_size, hidden_size, num_layers, num_classes):
    """Deterministic init mirroring PyTorch default uniform(-1/sqrt(H), 1/sqrt(H)).

    Layout: per layer W_ih^T (Din, 4H), W_hh^T (H, 4H) with PyTorch gate order
    [i, f, g, o], fused bias b_ih + b_hh of shape (1, 4H); FC as (H, C)."""
    H = hidden_size
    k_lstm = 1.0 / math.sqrt(H)
    layers = []
    for layer in range(num_layers):
        d_in = input_size if layer == 0 else H
        key, k1, k2, k3, k4 = jax.random.split(key, 5)
        wih_t = jax.random.uniform(k1, (d_in, 4 * H), jnp.float32, -k_lstm, k_lstm)
        whh_t = jax.random.uniform(k2, (H, 4 * H), jnp.float32, -k_lstm, k_lstm)
        b_ih = jax.random.uniform(k3, (1, 4 * H), jnp.float32, -k_lstm, k_lstm)
        b_hh = jax.random.uniform(k4, (1, 4 * H), jnp.float32, -k_lstm, k_lstm)
        layers.append((wih_t, whh_t, b_ih + b_hh))
    k_fc = 1.0 / math.sqrt(H)
    key, k5, k6 = jax.random.split(key, 3)
    fc_w_t = jax.random.uniform(k5, (H, num_classes), jnp.float32, -k_fc, k_fc)
    fc_b = jax.random.uniform(k6, (1, num_classes), jnp.float32, -k_fc, k_fc)
    return {"layers": layers, "fc_w_t": fc_w_t, "fc_b": fc_b}


if __name__ == "__main__":
    batch = 2
    seq_len = 8
    input_size = 16
    hidden_size = 32
    num_layers = 2
    num_classes = 10

    key = jax.random.PRNGKey(0)
    key, kx = jax.random.split(key)
    x = jax.random.normal(kx, (batch, seq_len, input_size), jnp.float32)

    params = init_params(key, input_size, hidden_size, num_layers, num_classes)

    out = lstm_forward(x, params, hidden_size=hidden_size,
                       num_layers=num_layers, num_classes=num_classes)
    out = jax.block_until_ready(out)
    assert out.shape == (batch, num_classes)
    assert bool(jnp.all(jnp.isfinite(out)))
    print("KERNEL_OK")
</pallas_src>

<mosaic_0001>
module attributes {stable_mosaic.version = 11 : i64} {
  func.func @lstm_kernel(%arg0: i32, %arg1: memref<1x8x8x128xbf16, #tpu.memory_space<vmem>>, %arg2: memref<128x512xbf16, #tpu.memory_space<vmem>>, %arg3: memref<128x512xbf16, #tpu.memory_space<vmem>>, %arg4: memref<1x512xf32, #tpu.memory_space<vmem>>, %arg5: memref<128x512xbf16, #tpu.memory_space<vmem>>, %arg6: memref<128x512xbf16, #tpu.memory_space<vmem>>, %arg7: memref<1x512xf32, #tpu.memory_space<vmem>>, %arg8: memref<128x128xbf16, #tpu.memory_space<vmem>>, %arg9: memref<1x128xf32, #tpu.memory_space<vmem>>, %arg10: memref<8x128xf32, #tpu.memory_space<vmem>>, %arg11: memref<64x512xf32, #tpu.memory_space<vmem>>, %arg12: memref<64x128xbf16, #tpu.memory_space<vmem>>, %arg13: memref<8x128xf32, #tpu.memory_space<vmem>>, %arg14: memref<8x128xf32, #tpu.memory_space<vmem>>) attributes {dimension_semantics = [#tpu.dimension_semantics<parallel>], iteration_bounds = array<i64: 1>, scalar_prefetch = 0 : i64, scratch_operands = 4 : i64, tpu.core_type = #tpu.core_type<tc>, window_params = [{transform_indices = @transform_0, window_bounds = array<i64: 1, 8, 8, 128>}, {pipeline_mode = #tpu.pipeline_mode<synchronous>, transform_indices = @transform_1, window_bounds = array<i64: 128, 512>}, {pipeline_mode = #tpu.pipeline_mode<synchronous>, transform_indices = @transform_2, window_bounds = array<i64: 128, 512>}, {pipeline_mode = #tpu.pipeline_mode<synchronous>, transform_indices = @transform_3, window_bounds = array<i64: 1, 512>}, {pipeline_mode = #tpu.pipeline_mode<synchronous>, transform_indices = @transform_4, window_bounds = array<i64: 128, 512>}, {pipeline_mode = #tpu.pipeline_mode<synchronous>, transform_indices = @transform_5, window_bounds = array<i64: 128, 512>}, {pipeline_mode = #tpu.pipeline_mode<synchronous>, transform_indices = @transform_6, window_bounds = array<i64: 1, 512>}, {pipeline_mode = #tpu.pipeline_mode<synchronous>, transform_indices = @transform_7, window_bounds = array<i64: 128, 128>}, {pipeline_mode = #tpu.pipeline_mode<synchronous>, transform_indices = @transform_8, window_bounds = array<i64: 1, 128>}, {transform_indices = @transform_9, window_bounds = array<i64: 8, 128>}]} {
    %c0 = arith.constant 0 : index
    %c0_0 = arith.constant 0 : index
    %0 = vector.load %arg2[%c0, %c0_0] : memref<128x512xbf16, #tpu.memory_space<vmem>>, vector<128x512xbf16>
    %c0_1 = arith.constant 0 : index
    %c0_2 = arith.constant 0 : index
    %1 = vector.load %arg3[%c0_1, %c0_2] : memref<128x512xbf16, #tpu.memory_space<vmem>>, vector<128x512xbf16>
    %c0_3 = arith.constant 0 : index
    %c0_4 = arith.constant 0 : index
    %2 = vector.load %arg4[%c0_3, %c0_4] : memref<1x512xf32, #tpu.memory_space<vmem>>, vector<1x512xf32>
    %cst = arith.constant 0.000000e+00 : f32
    %3 = vector.broadcast %cst : f32 to vector<8x128xf32>
    %c0_5 = arith.constant 0 : index
    %c0_6 = arith.constant 0 : index
    %4 = vector.load %arg13[%c0_5, %c0_6] : memref<8x128xf32, #tpu.memory_space<vmem>>, vector<8x128xf32>
    tpu.vector_store %arg13[%c0_5, %c0_6], %3 {strides = array<i32>} : memref<8x128xf32, #tpu.memory_space<vmem>>, vector<8x128xf32>,
    %cst_7 = arith.constant 0.000000e+00 : f32
    %5 = vector.broadcast %cst_7 : f32 to vector<8x128xf32>
    %c0_8 = arith.constant 0 : index
    %c0_9 = arith.constant 0 : index
    %6 = vector.load %arg14[%c0_8, %c0_9] : memref<8x128xf32, #tpu.memory_space<vmem>>, vector<8x128xf32>
    tpu.vector_store %arg14[%c0_8, %c0_9], %5 {strides = array<i32>} : memref<8x128xf32, #tpu.memory_space<vmem>>, vector<8x128xf32>,
    %c0_i32 = arith.constant 0 : i32
    %c1_i32 = arith.constant 1 : i32
    %7 = arith.muli %c0_i32, %c1_i32 : i32
    %c0_i32_10 = arith.constant 0 : i32
    %8 = arith.addi %c0_i32_10, %7 : i32
    %c8_i32 = arith.constant 8 : i32
    %9 = arith.muli %8, %c8_i32 : i32
    %10 = tpu.assume_multiple %9, 8 : i32
    %c64_i32 = arith.constant 64 : i32
    %11 = arith.muli %8, %c64_i32 : i32
    %12 = tpu.assume_multiple %11, 64 : i32
    %c0_11 = arith.constant 0 : index
    %13 = arith.index_cast %10 : i32 to index
    %c0_12 = arith.constant 0 : index
    %c0_13 = arith.constant 0 : index
    %14 = vector.load %arg1[%c0_11, %13, %c0_12, %c0_13] : memref<1x8x8x128xbf16, #tpu.memory_space<vmem>>, vector<1x8x8x128xbf16>
    %15 = vector.shape_cast %14 : vector<1x8x8x128xbf16> to vector<8x8x128xbf16>
    %16 = vector.shape_cast %15 : vector<8x8x128xbf16> to vector<64x128xbf16>
    %cst_14 = arith.constant dense<0.000000e+00> : vector<64x512xf32>
    %17 = tpu.matmul %16, %0, %cst_14 {dimension_numbers = #tpu.dot_dimension_numbers<[1], [0], [0], [1], [0, 0, 1, 1], [], []>} : vector<64x128xbf16>, vector<128x512xbf16>, vector<64x512xf32> -> vector<64x512xf32>
    %18 = vector.broadcast %2 : vector<1x512xf32> to vector<64x512xf32>
    %19 = arith.addf %17, %18 : vector<64x512xf32>
    %c0_15 = arith.constant 0 : index
    %c0_16 = arith.constant 0 : index
    %20 = vector.load %arg11[%c0_15, %c0_16] : memref<64x512xf32, #tpu.memory_space<vmem>>, vector<64x512xf32>
    tpu.vector_store %arg11[%c0_15, %c0_16], %19 {strides = array<i32>} : memref<64x512xf32, #tpu.memory_space<vmem>>, vector<64x512xf32>,
    %c0_i32_17 = arith.constant 0 : i32
    %c8_i32_18 = arith.constant 8 : i32
    %21 = arith.addi %c0_i32_17, %c8_i32_18 : i32
    %c1_i32_19 = arith.constant 1 : i32
    scf.for %arg15 = %c0_i32_17 to %21 step %c1_i32_19  : i32 {
      %c1_i32_56 = arith.constant 1 : i32
      %48 = arith.muli %arg15, %c1_i32_56 : i32
      %c0_i32_57 = arith.constant 0 : i32
      %49 = arith.addi %c0_i32_57, %48 : i32
      %c8_i32_58 = arith.constant 8 : i32
      %50 = arith.muli %49, %c8_i32_58 : i32
      %51 = tpu.assume_multiple %50, 8 : i32
      %c0_59 = arith.constant 0 : index
      %c0_60 = arith.constant 0 : index
      %52 = vector.load %arg13[%c0_59, %c0_60] : memref<8x128xf32, #tpu.memory_space<vmem>>, vector<8x128xf32>
      %c0_61 = arith.constant 0 : index
      %c0_62 = arith.constant 0 : index
      %53 = vector.load %arg14[%c0_61, %c0_62] : memref<8x128xf32, #tpu.memory_space<vmem>>, vector<8x128xf32>
      %54 = arith.index_cast %51 : i32 to index
      %c0_63 = arith.constant 0 : index
      %55 = vector.load %arg11[%54, %c0_63] : memref<64x512xf32, #tpu.memory_space<vmem>>, vector<8x512xf32>
      %56 = arith.truncf %52 : vector<8x128xf32> to vector<8x128xbf16>
      %cst_64 = arith.constant dense<0.000000e+00> : vector<8x512xf32>
      %57 = tpu.matmul %56, %1, %cst_64 {dimension_numbers = #tpu.dot_dimension_numbers<[1], [0], [0], [1], [0, 0, 1, 1], [], []>} : vector<8x128xbf16>, vector<128x512xbf16>, vector<8x512xf32> -> vector<8x512xf32>
      %58 = arith.addf %55, %57 : vector<8x512xf32>
      %59 = vector.extract_strided_slice %58 {offsets = [0, 0], sizes = [8, 384], strides = [1, 1]} : vector<8x512xf32> to vector<8x384xf32>
      %cst_65 = arith.constant 5.000000e-01 : f32
      %60 = vector.broadcast %cst_65 : f32 to vector<8x384xf32>
      %61 = arith.mulf %60, %59 : vector<8x384xf32>
      %62 = math.tanh %61 : vector<8x384xf32>
      %cst_66 = arith.constant 5.000000e-01 : f32
      %63 = vector.broadcast %cst_66 : f32 to vector<8x384xf32>
      %64 = arith.mulf %63, %62 : vector<8x384xf32>
      %cst_67 = arith.constant 5.000000e-01 : f32
      %65 = vector.broadcast %cst_67 : f32 to vector<8x384xf32>
      %66 = arith.addf %64, %65 : vector<8x384xf32>
      %67 = vector.extract_strided_slice %58 {offsets = [0, 384], sizes = [8, 128], strides = [1, 1]} : vector<8x512xf32> to vector<8x128xf32>
      %68 = math.tanh %67 : vector<8x128xf32>
      %69 = vector.extract_strided_slice %66 {offsets = [0, 0], sizes = [8, 128], strides = [1, 1]} : vector<8x384xf32> to vector<8x128xf32>
      %70 = vector.extract_strided_slice %66 {offsets = [0, 128], sizes = [8, 128], strides = [1, 1]} : vector<8x384xf32> to vector<8x128xf32>
      %71 = vector.extract_strided_slice %66 {offsets = [0, 256], sizes = [8, 128], strides = [1, 1]} : vector<8x384xf32> to vector<8x128xf32>
      %72 = arith.mulf %70, %53 : vector<8x128xf32>
      %73 = arith.mulf %69, %68 : vector<8x128xf32>
      %74 = arith.addf %72, %73 : vector<8x128xf32>
      %75 = math.tanh %74 : vector<8x128xf32>
      %76 = arith.mulf %71, %75 : vector<8x128xf32>
      %c0_68 = arith.constant 0 : index
      %c0_69 = arith.constant 0 : index
      %77 = vector.load %arg13[%c0_68, %c0_69] : memref<8x128xf32, #tpu.memory_space<vmem>>, vector<8x128xf32>
      tpu.vector_store %arg13[%c0_68, %c0_69], %76 {strides = array<i32>} : memref<8x128xf32, #tpu.memory_space<vmem>>, vector<8x128xf32>,
      %c0_70 = arith.constant 0 : index
      %c0_71 = arith.constant 0 : index
      %78 = vector.load %arg14[%c0_70, %c0_71] : memref<8x128xf32, #tpu.memory_space<vmem>>, vector<8x128xf32>
      tpu.vector_store %arg14[%c0_70, %c0_71], %74 {strides = array<i32>} : memref<8x128xf32, #tpu.memory_space<vmem>>, vector<8x128xf32>,
      %79 = arith.truncf %76 : vector<8x128xf32> to vector<8x128xbf16>
      %80 = arith.addi %12, %51 : i32
      %81 = tpu.assume_multiple %80, 8 : i32
      %82 = arith.index_cast %81 : i32 to index
      %c0_72 = arith.constant 0 : index
      %83 = vector.load %arg12[%82, %c0_72] : memref<64x128xbf16, #tpu.memory_space<vmem>>, vector<8x128xbf16>
      tpu.vector_store %arg12[%82, %c0_72], %79 {strides = array<i32>} : memref<64x128xbf16, #tpu.memory_space<vmem>>, vector<8x128xbf16>,
    }
    %c8_i32_20 = arith.constant 8 : i32
    %c1_i32_21 = arith.constant 1 : i32
    %c0_22 = arith.constant 0 : index
    %c0_23 = arith.constant 0 : index
    %22 = vector.load %arg5[%c0_22, %c0_23] : memref<128x512xbf16, #tpu.memory_space<vmem>>, vector<128x512xbf16>
    %c0_24 = arith.constant 0 : index
    %c0_25 = arith.constant 0 : index
    %23 = vector.load %arg6[%c0_24, %c0_25] : memref<128x512xbf16, #tpu.memory_space<vmem>>, vector<128x512xbf16>
    %c0_26 = arith.constant 0 : index
    %c0_27 = arith.constant 0 : index
    %24 = vector.load %arg7[%c0_26, %c0_27] : memref<1x512xf32, #tpu.memory_space<vmem>>, vector<1x512xf32>
    %cst_28 = arith.constant 0.000000e+00 : f32
    %25 = vector.broadcast %cst_28 : f32 to vector<8x128xf32>
    %c0_29 = arith.constant 0 : index
    %c0_30 = arith.constant 0 : index
    %26 = vector.load %arg13[%c0_29, %c0_30] : memref<8x128xf32, #tpu.memory_space<vmem>>, vector<8x128xf32>
    tpu.vector_store %arg13[%c0_29, %c0_30], %25 {strides = array<i32>} : memref<8x128xf32, #tpu.memory_space<vmem>>, vector<8x128xf32>,
    %cst_31 = arith.constant 0.000000e+00 : f32
    %27 = vector.broadcast %cst_31 : f32 to vector<8x128xf32>
    %c0_32 = arith.constant 0 : index
    %c0_33 = arith.constant 0 : index
    %28 = vector.load %arg14[%c0_32, %c0_33] : memref<8x128xf32, #tpu.memory_space<vmem>>, vector<8x128xf32>
    tpu.vector_store %arg14[%c0_32, %c0_33], %27 {strides = array<i32>} : memref<8x128xf32, #tpu.memory_space<vmem>>, vector<8x128xf32>,
    %c0_i32_34 = arith.constant 0 : i32
    %c1_i32_35 = arith.constant 1 : i32
    %29 = arith.muli %c0_i32_34, %c1_i32_35 : i32
    %c0_i32_36 = arith.constant 0 : i32
    %30 = arith.addi %c0_i32_36, %29 : i32
    %c64_i32_37 = arith.constant 64 : i32
    %31 = arith.muli %30, %c64_i32_37 : i32
    %32 = tpu.assume_multiple %31, 64 : i32
    %33 = arith.index_cast %32 : i32 to index
    %c0_38 = arith.constant 0 : index
    %34 = vector.load %arg12[%33, %c0_38] : memref<64x128xbf16, #tpu.memory_space<vmem>>, vector<64x128xbf16>
    %cst_39 = arith.constant dense<0.000000e+00> : vector<64x512xf32>
    %35 = tpu.matmul %34, %22, %cst_39 {dimension_numbers = #tpu.dot_dimension_numbers<[1], [0], [0], [1], [0, 0, 1, 1], [], []>} : vector<64x128xbf16>, vector<128x512xbf16>, vector<64x512xf32> -> vector<64x512xf32>
    %36 = vector.broadcast %24 : vector<1x512xf32> to vector<64x512xf32>
    %37 = arith.addf %35, %36 : vector<64x512xf32>
    %c0_40 = arith.constant 0 : index
    %c0_41 = arith.constant 0 : index
    %38 = vector.load %arg11[%c0_40, %c0_41] : memref<64x512xf32, #tpu.memory_space<vmem>>, vector<64x512xf32>
    tpu.vector_store %arg11[%c0_40, %c0_41], %37 {strides = array<i32>} : memref<64x512xf32, #tpu.memory_space<vmem>>, vector<64x512xf32>,
    %c0_i32_42 = arith.constant 0 : i32
    %c8_i32_43 = arith.constant 8 : i32
    %39 = arith.addi %c0_i32_42, %c8_i32_43 : i32
    %c1_i32_44 = arith.constant 1 : i32
    scf.for %arg15 = %c0_i32_42 to %39 step %c1_i32_44  : i32 {
      %c1_i32_56 = arith.constant 1 : i32
      %48 = arith.muli %arg15, %c1_i32_56 : i32
      %c0_i32_57 = arith.constant 0 : i32
      %49 = arith.addi %c0_i32_57, %48 : i32
      %c8_i32_58 = arith.constant 8 : i32
      %50 = arith.muli %49, %c8_i32_58 : i32
      %51 = tpu.assume_multiple %50, 8 : i32
      %c0_59 = arith.constant 0 : index
      %c0_60 = arith.constant 0 : index
      %52 = vector.load %arg13[%c0_59, %c0_60] : memref<8x128xf32, #tpu.memory_space<vmem>>, vector<8x128xf32>
      %c0_61 = arith.constant 0 : index
      %c0_62 = arith.constant 0 : index
      %53 = vector.load %arg14[%c0_61, %c0_62] : memref<8x128xf32, #tpu.memory_space<vmem>>, vector<8x128xf32>
      %54 = arith.index_cast %51 : i32 to index
      %c0_63 = arith.constant 0 : index
      %55 = vector.load %arg11[%54, %c0_63] : memref<64x512xf32, #tpu.memory_space<vmem>>, vector<8x512xf32>
      %56 = arith.truncf %52 : vector<8x128xf32> to vector<8x128xbf16>
      %cst_64 = arith.constant dense<0.000000e+00> : vector<8x512xf32>
      %57 = tpu.matmul %56, %23, %cst_64 {dimension_numbers = #tpu.dot_dimension_numbers<[1], [0], [0], [1], [0, 0, 1, 1], [], []>} : vector<8x128xbf16>, vector<128x512xbf16>, vector<8x512xf32> -> vector<8x512xf32>
      %58 = arith.addf %55, %57 : vector<8x512xf32>
      %59 = vector.extract_strided_slice %58 {offsets = [0, 0], sizes = [8, 384], strides = [1, 1]} : vector<8x512xf32> to vector<8x384xf32>
      %cst_65 = arith.constant 5.000000e-01 : f32
      %60 = vector.broadcast %cst_65 : f32 to vector<8x384xf32>
      %61 = arith.mulf %60, %59 : vector<8x384xf32>
      %62 = math.tanh %61 : vector<8x384xf32>
      %cst_66 = arith.constant 5.000000e-01 : f32
      %63 = vector.broadcast %cst_66 : f32 to vector<8x384xf32>
      %64 = arith.mulf %63, %62 : vector<8x384xf32>
      %cst_67 = arith.constant 5.000000e-01 : f32
      %65 = vector.broadcast %cst_67 : f32 to vector<8x384xf32>
      %66 = arith.addf %64, %65 : vector<8x384xf32>
      %67 = vector.extract_strided_slice %58 {offsets = [0, 384], sizes = [8, 128], strides = [1, 1]} : vector<8x512xf32> to vector<8x128xf32>
      %68 = math.tanh %67 : vector<8x128xf32>
      %69 = vector.extract_strided_slice %66 {offsets = [0, 0], sizes = [8, 128], strides = [1, 1]} : vector<8x384xf32> to vector<8x128xf32>
      %70 = vector.extract_strided_slice %66 {offsets = [0, 128], sizes = [8, 128], strides = [1, 1]} : vector<8x384xf32> to vector<8x128xf32>
      %71 = vector.extract_strided_slice %66 {offsets = [0, 256], sizes = [8, 128], strides = [1, 1]} : vector<8x384xf32> to vector<8x128xf32>
      %72 = arith.mulf %70, %53 : vector<8x128xf32>
      %73 = arith.mulf %69, %68 : vector<8x128xf32>
      %74 = arith.addf %72, %73 : vector<8x128xf32>
      %75 = math.tanh %74 : vector<8x128xf32>
      %76 = arith.mulf %71, %75 : vector<8x128xf32>
      %c0_68 = arith.constant 0 : index
      %c0_69 = arith.constant 0 : index
      %77 = vector.load %arg13[%c0_68, %c0_69] : memref<8x128xf32, #tpu.memory_space<vmem>>, vector<8x128xf32>
      tpu.vector_store %arg13[%c0_68, %c0_69], %76 {strides = array<i32>} : memref<8x128xf32, #tpu.memory_space<vmem>>, vector<8x128xf32>,
      %c0_70 = arith.constant 0 : index
      %c0_71 = arith.constant 0 : index
      %78 = vector.load %arg14[%c0_70, %c0_71] : memref<8x128xf32, #tpu.memory_space<vmem>>, vector<8x128xf32>
      tpu.vector_store %arg14[%c0_70, %c0_71], %74 {strides = array<i32>} : memref<8x128xf32, #tpu.memory_space<vmem>>, vector<8x128xf32>,
    }
    %c8_i32_45 = arith.constant 8 : i32
    %c1_i32_46 = arith.constant 1 : i32
    %c0_47 = arith.constant 0 : index
    %c0_48 = arith.constant 0 : index
    %40 = vector.load %arg13[%c0_47, %c0_48] : memref<8x128xf32, #tpu.memory_space<vmem>>, vector<8x128xf32>
    %41 = arith.truncf %40 : vector<8x128xf32> to vector<8x128xbf16>
    %c0_49 = arith.constant 0 : index
    %c0_50 = arith.constant 0 : index
    %42 = vector.load %arg8[%c0_49, %c0_50] : memref<128x128xbf16, #tpu.memory_space<vmem>>, vector<128x128xbf16>
    %cst_51 = arith.constant dense<0.000000e+00> : vector<8x128xf32>
    %43 = tpu.matmul %41, %42, %cst_51 {dimension_numbers = #tpu.dot_dimension_numbers<[1], [0], [0], [1], [0, 0, 1, 1], [], []>} : vector<8x128xbf16>, vector<128x128xbf16>, vector<8x128xf32> -> vector<8x128xf32>
    %c0_52 = arith.constant 0 : index
    %c0_53 = arith.constant 0 : index
    %44 = vector.load %arg9[%c0_52, %c0_53] : memref<1x128xf32, #tpu.memory_space<vmem>>, vector<1x128xf32>
    %45 = vector.broadcast %44 : vector<1x128xf32> to vector<8x128xf32>
    %46 = arith.addf %43, %45 : vector<8x128xf32>
    %c0_54 = arith.constant 0 : index
    %c0_55 = arith.constant 0 : index
    %47 = vector.load %arg10[%c0_54, %c0_55] : memref<8x128xf32, #tpu.memory_space<vmem>>, vector<8x128xf32>
    tpu.vector_store %arg10[%c0_54, %c0_55], %46 {strides = array<i32>} : memref<8x128xf32, #tpu.memory_space<vmem>>, vector<8x128xf32>,
    return
  }
  func.func @transform_0(%arg0: i32) -> (i32, i32, i32, i32) {
    %c0_i32 = arith.constant 0 : i32
    %c0_i32_0 = arith.constant 0 : i32
    %c0_i32_1 = arith.constant 0 : i32
    %c0_i32_2 = arith.constant 0 : i32
    return %arg0, %c0_i32, %c0_i32_0, %c0_i32_1 : i32, i32, i32, i32
  }
  func.func @transform_1(%arg0: i32) -> (i32, i32) {
    %c0_i32 = arith.constant 0 : i32
    %c0_i32_0 = arith.constant 0 : i32
    %c0_i32_1 = arith.constant 0 : i32
    return %c0_i32, %c0_i32_0 : i32, i32
  }
  func.func @transform_2(%arg0: i32) -> (i32, i32) {
    %c0_i32 = arith.constant 0 : i32
    %c0_i32_0 = arith.constant 0 : i32
    %c0_i32_1 = arith.constant 0 : i32
    return %c0_i32, %c0_i32_0 : i32, i32
  }
  func.func @transform_3(%arg0: i32) -> (i32, i32) {
    %c0_i32 = arith.constant 0 : i32
    %c0_i32_0 = arith.constant 0 : i32
    %c0_i32_1 = arith.constant 0 : i32
    return %c0_i32, %c0_i32_0 : i32, i32
  }
  func.func @transform_4(%arg0: i32) -> (i32, i32) {
    %c0_i32 = arith.constant 0 : i32
    %c0_i32_0 = arith.constant 0 : i32
    %c0_i32_1 = arith.constant 0 : i32
    return %c0_i32, %c0_i32_0 : i32, i32
  }
  func.func @transform_5(%arg0: i32) -> (i32, i32) {
    %c0_i32 = arith.constant 0 : i32
    %c0_i32_0 = arith.constant 0 : i32
    %c0_i32_1 = arith.constant 0 : i32
    return %c0_i32, %c0_i32_0 : i32, i32
  }
  func.func @transform_6(%arg0: i32) -> (i32, i32) {
    %c0_i32 = arith.constant 0 : i32
    %c0_i32_0 = arith.constant 0 : i32
    %c0_i32_1 = arith.constant 0 : i32
    return %c0_i32, %c0_i32_0 : i32, i32
  }
  func.func @transform_7(%arg0: i32) -> (i32, i32) {
    %c0_i32 = arith.constant 0 : i32
    %c0_i32_0 = arith.constant 0 : i32
    %c0_i32_1 = arith.constant 0 : i32
    return %c0_i32, %c0_i32_0 : i32, i32
  }
  func.func @transform_8(%arg0: i32) -> (i32, i32) {
    %c0_i32 = arith.constant 0 : i32
    %c0_i32_0 = arith.constant 0 : i32
    %c0_i32_1 = arith.constant 0 : i32
    return %c0_i32, %c0_i32_0 : i32, i32
  }
  func.func @transform_9(%arg0: i32) -> (i32, i32) {
    %c0_i32 = arith.constant 0 : i32
    %c0_i32_0 = arith.constant 0 : i32
    return %arg0, %c0_i32 : i32, i32
  }
}

</mosaic_0001>

<bundles_post_ra>
// kernel: tpu_custom_call.1
= control target key start
LH: loop header
LB: loop body
LE: loop exit
PB: predicated region body
PF: predicated region fallthrough
CT: control target
= control target key end

     0   :  { %14 = vsyncpa [#allocation7], 0  ;;  %s3201_s0 = inlined_call_operand.hbm [shape: bf16[1,8,8,128], index: 0, kind: input, shape index: {}]   ;;  %s3202_s1 = inlined_call_operand.hbm [shape: bf16[128,512], index: 1, kind: input, shape index: {}]   ;;  %s3203_s2 = inlined_call_operand.hbm [shape: bf16[128,512], index: 2, kind: input, shape index: {}]   ;;  %s3204_s3 = inlined_call_operand.hbm [shape: f32[1,512], index: 3, kind: input, shape index: {}]   ;;  %s3205_s4 = inlined_call_operand.hbm [shape: bf16[128,512], index: 4, kind: input, shape index: {}]   ;;  %s3206_s5 = inlined_call_operand.hbm [shape: bf16[128,512], index: 5, kind: input, shape index: {}]   ;;  %s3207_s6 = inlined_call_operand.vmem [shape: f32[1,512], index: 6, kind: input, shape index: {}]   ;;  %s3208_s7 = inlined_call_operand.hbm [shape: bf16[128,128], index: 7, kind: input, shape index: {}]   ;;  %s3209_s8 = inlined_call_operand.vmem [shape: f32[1,128], index: 8, kind: input, shape index: {}]   ;;  %s3210_s9 = inlined_call_operand.hbm [shape: f32[8,128], index: 9, kind: output, shape index: {}]  }
   0x1   :  { %15 = vsyncpa [#allocation10], 0 }
   0x2   :  { %16 = vsyncpa [#allocation13], 0 }
   0x3   :  { %17 = vsyncpa [#allocation16], 0  ;;  %s36_s11 = sshll.u32 %s3202_s1, 4  ;;  %s37_s11 = int_to_ptr.hbm [resolvable:$true] %s36_s11 }
   0x4   :  { %18 = vsyncpa [#allocation8], 0  ;;  %s2606_s12 = smov [#allocation9]   ;;  %s63_s16 = sshll.u32 %s3204_s3, 4  ;;  %s64_s16 = int_to_ptr.hbm [resolvable:$true] %s63_s16 }
   0x5   :  { %s38_s13 = sshll.u32 %s2606_s12, 4  ;;  %s2607_s17 = smov 256   ;;  %s39_s13 = int_to_ptr.vmem [resolvable:$true] %s38_s13 }
   0x6   :  { %s2608_s18 = smov 16   ;;  %s2609_s19 = smov [#allocation12]  }
   0x7   :  { %44 = dma.hbm_to_vmem [thread:$0]  %s37_s11, 4096, %s39_s13, [#allocation10], %s2607_s17, %s2607_s17, %s2608_s18  }
   0x8   :  { %s65_s20 = sshll.u32 %s2609_s19, 4  ;;  %s86_s22 = sshll.u32 %s3206_s5, 4  ;;  %s66_s20 = int_to_ptr.vmem [resolvable:$true] %s65_s20  ;;  %s87_s22 = int_to_ptr.hbm [resolvable:$true] %s86_s22 }
   0x9   :  { %68 = dma.hbm_to_vmem [thread:$0]  %s64_s16, 64, %s66_s20, [#allocation13]  }
   0xa   :  { %s23_s3 = sshll.u32 %s3201_s0, 4  ;;  %s2610_s25 = smov [#allocation15]   ;;  %s24_s3 = int_to_ptr.hbm [resolvable:$true] %s23_s3 }
   0xb   :  { %s88_s26 = sshll.u32 %s2610_s25, 4  ;;  %s2611_s27 = smov [#allocation6]   ;;  %s89_s26 = int_to_ptr.vmem [resolvable:$true] %s88_s26 }
   0xc   :  { %94 = dma.hbm_to_vmem [thread:$0]  %s87_s22, 4096, %s89_s26, [#allocation16], %s2607_s17, %s2607_s17, %s2608_s18  }
   0xd   :  { %s25_s28 = sshll.u32 %s2611_s27, 4  ;;  %s2612_s29 = smov 64   ;;  %s26_s28 = int_to_ptr.vmem [resolvable:$true] %s25_s28 }
   0xe   :  { %s2613_s5 = smov 4   ;;  %s49_s11 = sshll.u32 %s3203_s2, 4  ;;  %s50_s11 = int_to_ptr.hbm [resolvable:$true] %s49_s11 }
   0xf   :  { %31 = dma.hbm_to_vmem [thread:$0]  %s24_s3, 512, %s26_s28, [#allocation7], %s2612_s29, %s2612_s29, %s2613_s5  }
  0x10   :  { %s2614_s0 = smov [#allocation11]   ;;  %s73_s15 = sshll.u32 %s3205_s4, 4  ;;  %s74_s15 = int_to_ptr.hbm [resolvable:$true] %s73_s15 }
  0x11   :  { %s51_s12 = sshll.u32 %s2614_s0, 4  ;;  %s2615_s16 = smov [#allocation14]   ;;  %s52_s12 = int_to_ptr.vmem [resolvable:$true] %s51_s12 }
  0x12   :  { %57 = dma.hbm_to_vmem [thread:$0]  %s50_s11, 4096, %s52_s12, [#allocation10], %s2607_s17, %s2607_s17, %s2608_s18  }
  0x13   :  { %s75_s19 = sshll.u32 %s2615_s16, 4  ;;  %s101_s1 = sshll.u32 %s3208_s7, 4  ;;  %s76_s19 = int_to_ptr.vmem [resolvable:$true] %s75_s19  ;;  %s102_s1 = int_to_ptr.hbm [resolvable:$true] %s101_s1 }
  0x14   :  { %81 = dma.hbm_to_vmem [thread:$0]  %s74_s15, 4096, %s76_s19, [#allocation13], %s2607_s17, %s2607_s17, %s2608_s18  }
  0x15   :  { %s2616_s2 = smov [#allocation17]  }
  0x16   :  { %s103_s22 = sshll.u32 %s2616_s2, 4  ;;  %s104_s22 = int_to_ptr.vmem [resolvable:$true] %s103_s22 }
  0x17   :  { %109 = dma.hbm_to_vmem [thread:$0]  %s102_s1, 1024, %s104_s22, [#allocation16], %s2612_s29, %s2612_s29, %s2613_s5  }
  0x18   :  { %2588 = dma.done.wait [#allocation7], 512  }
  0x19   :  { %2589 = vsyncadd [#allocation7], 4294966784 }
  0x1a   :  { %2590 = dma.done.wait [#allocation10], 8192  }
  0x1b   :  { %2591 = vsyncadd [#allocation10], 4294959104 }
  0x1c   :  { %2592 = dma.done.wait [#allocation13], 4160  }
  0x1d   :  { %2593 = vsyncadd [#allocation13], 4294963136 }
  0x1e   :  { %2594 = dma.done.wait [#allocation16], 5120  }
  0x1f   :  { %2595 = vsyncadd [#allocation16], 4294962176  ;;  %v3211_v0 = vmov 0.0   ;;  %v2704_v1 = vld [vmem:[#allocation11 + $0x4] sm:$0xf]  ;;  %s2872_s4 = smov 0  }
  0x20   :  { %205 = vst [vmem:[#allocation4] sm:$0xff] %v3211_v0  ;;  %v2706_v2 = vld [vmem:[#allocation11] sm:$0xf]  ;;  %v2708_v3 = vld [vmem:[#allocation11 + $0xc] sm:$0xf] }
  0x21   :  { %206 = vst [vmem:[#allocation5] sm:$0xff] %v3211_v0  ;;  %v2710_v4 = vld [vmem:[#allocation11 + $0x8] sm:$0xf]  ;;  %v2712_v5 = vld [vmem:[#allocation11 + $0x10] sm:$0xf0] }
  0x22   :  { %3213 = vst [vmem:[#allocation24_spill] sm:$0xff] %v2704_v1  ;;  %v2714_v6 = vld [vmem:[#allocation11 + $0xc] sm:$0xf0]  ;;  %v2716_v7 = vld [vmem:[#allocation11 + $0x18] sm:$0xf0] }
  0x23   :  { %3214 = vst [vmem:[#allocation25_spill] sm:$0xff] %v2706_v2  ;;  %v2718_v8 = vld [vmem:[#allocation11 + $0x14] sm:$0xf0]  ;;  %v2720_v9 = vld [vmem:[#allocation11 + $0x24] sm:$0xf] }
  0x24   :  { %3215 = vst [vmem:[#allocation26_spill] sm:$0xff] %v2708_v3  ;;  %v2722_v10 = vld [vmem:[#allocation11 + $0x20] sm:$0xf]  ;;  %v2724_v11 = vld [vmem:[#allocation11 + $0x2c] sm:$0xf] }
  0x25   :  { %3216 = vst [vmem:[#allocation27_spill] sm:$0xff] %v2710_v4  ;;  %v2726_v12 = vld [vmem:[#allocation11 + $0x28] sm:$0xf]  ;;  %v2728_v13 = vld [vmem:[#allocation11 + $0x30] sm:$0xf0] }
  0x26   :  { %3217 = vst [vmem:[#allocation28_spill] sm:$0xff] %v2712_v5  ;;  %v2730_v14 = vld [vmem:[#allocation11 + $0x2c] sm:$0xf0]  ;;  %v2732_v15 = vld [vmem:[#allocation11 + $0x38] sm:$0xf0] }
  0x27   :  { %3218 = vst [vmem:[#allocation29_spill] sm:$0xff] %v2714_v6  ;;  %v2734_v16 = vld [vmem:[#allocation11 + $0x34] sm:$0xf0]  ;;  %v2736_v17 = vld [vmem:[#allocation11 + $0x44] sm:$0xf] }
  0x28   :  { %3219 = vst [vmem:[#allocation30_spill] sm:$0xff] %v2716_v7  ;;  %v2738_v18 = vld [vmem:[#allocation11 + $0x40] sm:$0xf]  ;;  %v2740_v19 = vld [vmem:[#allocation11 + $0x4c] sm:$0xf] }
  0x29   :  { %3220 = vst [vmem:[#allocation31_spill] sm:$0xff] %v2718_v8  ;;  %v2742_v20 = vld [vmem:[#allocation11 + $0x48] sm:$0xf]  ;;  %v2744_v21 = vld [vmem:[#allocation11 + $0x50] sm:$0xf0] }
  0x2a   :  { %3221 = vst [vmem:[#allocation32_spill] sm:$0xff] %v2720_v9  ;;  %v2746_v22 = vld [vmem:[#allocation11 + $0x4c] sm:$0xf0]  ;;  %v2748_v23 = vld [vmem:[#allocation11 + $0x58] sm:$0xf0] }
  0x2b   :  { %3222 = vst [vmem:[#allocation33_spill] sm:$0xff] %v2722_v10  ;;  %v2750_v24 = vld [vmem:[#allocation11 + $0x54] sm:$0xf0]  ;;  %v2752_v25 = vld [vmem:[#allocation11 + $0x64] sm:$0xf] }
  0x2c   :  { %3223 = vst [vmem:[#allocation34_spill] sm:$0xff] %v2724_v11  ;;  %v2754_v26 = vld [vmem:[#allocation11 + $0x60] sm:$0xf]  ;;  %v2756_v27 = vld [vmem:[#allocation11 + $0x6c] sm:$0xf] }
  0x2d   :  { %3224 = vst [vmem:[#allocation35_spill] sm:$0xff] %v2726_v12  ;;  %v2758_v28 = vld [vmem:[#allocation11 + $0x68] sm:$0xf]  ;;  %v2760_v29 = vld [vmem:[#allocation11 + $0x70] sm:$0xf0] }
  0x2e   :  { %3225 = vst [vmem:[#allocation36_spill] sm:$0xff] %v2728_v13  ;;  %v2762_v30 = vld [vmem:[#allocation11 + $0x6c] sm:$0xf0]  ;;  %v2764_v31 = vld [vmem:[#allocation11 + $0x78] sm:$0xf0] }
  0x2f   :  { %3226 = vst [vmem:[#allocation37_spill] sm:$0xff] %v2730_v14  ;;  %v2766_v32 = vld [vmem:[#allocation11 + $0x74] sm:$0xf0]  ;;  %v2768_v33 = vld [vmem:[#allocation11 + $0x84] sm:$0xf] }
  0x30   :  { %3227 = vst [vmem:[#allocation38_spill] sm:$0xff] %v2732_v15  ;;  %v2770_v34 = vld [vmem:[#allocation11 + $0x80] sm:$0xf]  ;;  %v2772_v35 = vld [vmem:[#allocation11 + $0x8c] sm:$0xf] }
  0x31   :  { %3228 = vst [vmem:[#allocation39_spill] sm:$0xff] %v2734_v16  ;;  %v2774_v36 = vld [vmem:[#allocation11 + $0x88] sm:$0xf]  ;;  %v2776_v37 = vld [vmem:[#allocation11 + $0x90] sm:$0xf0] }
  0x32   :  { %3229 = vst [vmem:[#allocation40_spill] sm:$0xff] %v2736_v17  ;;  %v2778_v38 = vld [vmem:[#allocation11 + $0x8c] sm:$0xf0]  ;;  %v2780_v39 = vld [vmem:[#allocation11 + $0x98] sm:$0xf0] }
  0x33   :  { %3230 = vst [vmem:[#allocation41_spill] sm:$0xff] %v2738_v18  ;;  %v2782_v40 = vld [vmem:[#allocation11 + $0x94] sm:$0xf0]  ;;  %v2784_v41 = vld [vmem:[#allocation11 + $0xa4] sm:$0xf] }
  0x34   :  { %3231 = vst [vmem:[#allocation42_spill] sm:$0xff] %v2740_v19  ;;  %v2786_v42 = vld [vmem:[#allocation11 + $0xa0] sm:$0xf]  ;;  %v2788_v43 = vld [vmem:[#allocation11 + $0xac] sm:$0xf] }
  0x35   :  { %3232 = vst [vmem:[#allocation43_spill] sm:$0xff] %v2742_v20  ;;  %v2790_v44 = vld [vmem:[#allocation11 + $0xa8] sm:$0xf]  ;;  %v2792_v45 = vld [vmem:[#allocation11 + $0xb0] sm:$0xf0] }
  0x36   :  { %3233 = vst [vmem:[#allocation44_spill] sm:$0xff] %v2744_v21  ;;  %v2794_v46 = vld [vmem:[#allocation11 + $0xac] sm:$0xf0]  ;;  %v2796_v47 = vld [vmem:[#allocation11 + $0xb8] sm:$0xf0] }
  0x37   :  { %3234 = vst [vmem:[#allocation45_spill] sm:$0xff] %v2746_v22  ;;  %v2798_v48 = vld [vmem:[#allocation11 + $0xb4] sm:$0xf0]  ;;  %v2800_v49 = vld [vmem:[#allocation11 + $0xc4] sm:$0xf] }
  0x38   :  { %3235 = vst [vmem:[#allocation46_spill] sm:$0xff] %v2748_v23  ;;  %v2802_v50 = vld [vmem:[#allocation11 + $0xc0] sm:$0xf]  ;;  %v2804_v51 = vld [vmem:[#allocation11 + $0xcc] sm:$0xf] }
  0x39   :  { %3236 = vst [vmem:[#allocation47_spill] sm:$0xff] %v2750_v24  ;;  %v2806_v52 = vld [vmem:[#allocation11 + $0xc8] sm:$0xf]  ;;  %v2808_v53 = vld [vmem:[#allocation11 + $0xd0] sm:$0xf0] }
  0x3a   :  { %3237 = vst [vmem:[#allocation48_spill] sm:$0xff] %v2756_v27  ;;  %v2810_v54 = vld [vmem:[#allocation11 + $0xcc] sm:$0xf0]  ;;  %v2812_v55 = vld [vmem:[#allocation11 + $0xd8] sm:$0xf0] }
  0x3b   :  { %3238 = vst [vmem:[#allocation49_spill] sm:$0xff] %v2764_v31  ;;  %v2814_v56 = vld [vmem:[#allocation11 + $0xd4] sm:$0xf0]  ;;  %v2816_v57 = vld [vmem:[#allocation11 + $0xe4] sm:$0xf] }
  0x3c   :  { %v2818_v58 = vld [vmem:[#allocation11 + $0xe0] sm:$0xf]  ;;  %v2820_v59 = vld [vmem:[#allocation11 + $0xec] sm:$0xf]  ;;  %v2822_v60 = vld [vmem:[#allocation11 + $0xe8] sm:$0xf] }
  0x3d   :  { %v2824_v61 = vld [vmem:[#allocation11 + $0xf0] sm:$0xf0]  ;;  %v2826_v62 = vld [vmem:[#allocation11 + $0xec] sm:$0xf0]  ;;  %v2828_v63 = vld [vmem:[#allocation11 + $0xf8] sm:$0xf0] }
  0x3e   :  { %v2830_v0 = vld [vmem:[#allocation11 + $0xf4] sm:$0xf0]  ;;  %v1739_v3 = vld [vmem:[#allocation9 + $0xe0] sm:$0xf]  ;;  %v2222_v7 = vld [vmem:[#allocation9 + $0xec] sm:$0xf0] }
  0x3f   :  { %v1740_v8 = vor.u32 %v2222_v7, %v1739_v3  ;;  %v2220_v4 = vld [vmem:[#allocation9 + $0xe4] sm:$0xf]  ;;  %v1741_v1 = vld [vmem:[#allocation9 + $0xf0] sm:$0xf0]  ;;  %v1747_v5 = vld [vmem:[#allocation9 + $0xe8] sm:$0xf] }
  0x40   :  { %v1744_v6 = vor.u32 %v2220_v4, %v1741_v1  ;;  %v2223_v2 = vld [vmem:[#allocation9 + $0xf4] sm:$0xf0]  ;;  %v2221_v11 = vld [vmem:[#allocation9 + $0xec] sm:$0xf]  ;;  %v1749_v15 = vld [vmem:[#allocation9 + $0xf8] sm:$0xf0] }
  0x41   :  { %408 = vmatpush.bf16.msra.mxu0 %v1740_v8  ;;  %v1748_v16 = vor.u32 %v2223_v2, %v1747_v5  ;;  %v1752_v12 = vor.u32 %v2221_v11, %v1749_v15  ;;  %v1723_v9 = vld [vmem:[#allocation9 + $0xc0] sm:$0xf]  ;;  %v2218_v13 = vld [vmem:[#allocation9 + $0xcc] sm:$0xf0]  ;;  %v2216_v14 = vld [vmem:[#allocation9 + $0xc4] sm:$0xf] }
  0x42   :  { %437 = vmatpush.bf16.msra.mxu1 %v1744_v6  ;;  %v1724_v10 = vor.u32 %v2218_v13, %v1723_v9  ;;  %v1725_v19 = vld [vmem:[#allocation9 + $0xd0] sm:$0xf0]  ;;  %v1731_v23 = vld [vmem:[#allocation9 + $0xc8] sm:$0xf]  ;;  %v2219_v24 = vld [vmem:[#allocation9 + $0xd4] sm:$0xf0] }
  0x43   :  { %466 = vmatpush.bf16.msra.mxu2 %v1748_v16  ;;  %495 = vmatpush.bf16.msra.mxu3 %v1752_v12  ;;  %v1728_v3 = vor.u32 %v2216_v14, %v1725_v19  ;;  %v1732_v7 = vor.u32 %v2219_v24, %v1731_v23  ;;  %v2217_v20 = vld [vmem:[#allocation9 + $0xcc] sm:$0xf]  ;;  %v1733_v1 = vld [vmem:[#allocation9 + $0xd8] sm:$0xf0]  ;;  %v1707_v4 = vld [vmem:[#allocation9 + $0xa0] sm:$0xf] }
  0x44   :  { %v1736_v17 = vor.u32 %v2217_v20, %v1733_v1  ;;  %v2214_v21 = vld [vmem:[#allocation9 + $0xac] sm:$0xf0]  ;;  %v2212_v8 = vld [vmem:[#allocation9 + $0xa4] sm:$0xf]  ;;  %v1709_v2 = vld [vmem:[#allocation9 + $0xb0] sm:$0xf0] }
  0x45   :  { %409 = vmatpush.bf16.msra.mxu0 %v1724_v10  ;;  %v1708_v5 = vor.u32 %v2214_v21, %v1707_v4  ;;  %v1715_v11 = vld [vmem:[#allocation9 + $0xa8] sm:$0xf]  ;;  %v2215_v15 = vld [vmem:[#allocation9 + $0xb4] sm:$0xf0]  ;;  %v2213_v6 = vld [vmem:[#allocation9 + $0xac] sm:$0xf]  ;;  %v1712_v9 = vor.u32 %v2212_v8, %v1709_v2 }
  0x46   :  { %438 = vmatpush.bf16.msra.mxu1 %v1728_v3  ;;  %v1717_v13 = vld [vmem:[#allocation9 + $0xb8] sm:$0xf0]  ;;  %v1691_v22 = vld [vmem:[#allocation9 + $0x80] sm:$0xf]  ;;  %v2210_v16 = vld [vmem:[#allocation9 + $0x8c] sm:$0xf0]  ;;  %v1716_v12 = vor.u32 %v2215_v15, %v1715_v11 }
  0x47   :  { %467 = vmatpush.bf16.msra.mxu2 %v1732_v7  ;;  %496 = vmatpush.bf16.msra.mxu3 %v1736_v17  ;;  %v1720_v14 = vor.u32 %v2213_v6, %v1717_v13  ;;  %v2208_v19 = vld [vmem:[#allocation9 + $0x84] sm:$0xf]  ;;  %v1693_v23 = vld [vmem:[#allocation9 + $0x90] sm:$0xf0]  ;;  %v1699_v20 = vld [vmem:[#allocation9 + $0x88] sm:$0xf]  ;;  %v1692_v10 = vor.u32 %v2210_v16, %v1691_v22 }
  0x48   :  { %v2211_v24 = vld [vmem:[#allocation9 + $0x94] sm:$0xf0]  ;;  %v2209_v1 = vld [vmem:[#allocation9 + $0x8c] sm:$0xf]  ;;  %v1701_v18 = vld [vmem:[#allocation9 + $0x98] sm:$0xf0]  ;;  %v1696_v21 = vor.u32 %v2208_v19, %v1693_v23 }
  0x49   :  { %410 = vmatpush.bf16.msra.mxu0 %v1708_v5  ;;  %v1675_v4 = vld [vmem:[#allocation9 + $0x60] sm:$0xf]  ;;  %v2206_v3 = vld [vmem:[#allocation9 + $0x6c] sm:$0xf0]  ;;  %v1700_v8 = vor.u32 %v2211_v24, %v1699_v20  ;;  %v1704_v2 = vor.u32 %v2209_v1, %v1701_v18  ;;  %v2204_v7 = vld [vmem:[#allocation9 + $0x64] sm:$0xf] }
  0x4a   :  { %439 = vmatpush.bf16.msra.mxu1 %v1712_v9  ;;  %v1677_v17 = vld [vmem:[#allocation9 + $0x70] sm:$0xf0]  ;;  %v1683_v11 = vld [vmem:[#allocation9 + $0x68] sm:$0xf]  ;;  %v2207_v15 = vld [vmem:[#allocation9 + $0x74] sm:$0xf0]  ;;  %v1676_v27 = vor.u32 %v2206_v3, %v1675_v4 }
  0x4b   :  { %468 = vmatpush.bf16.msra.mxu2 %v1716_v12  ;;  %497 = vmatpush.bf16.msra.mxu3 %v1720_v14  ;;  %v2205_v6 = vld [vmem:[#allocation9 + $0x6c] sm:$0xf]  ;;  %v1685_v13 = vld [vmem:[#allocation9 + $0x78] sm:$0xf0]  ;;  %v1680_v31 = vor.u32 %v2204_v7, %v1677_v17  ;;  %v1659_v5 = vld [vmem:[#allocation9 + $0x40] sm:$0xf]  ;;  %v1684_v9 = vor.u32 %v2207_v15, %v1683_v11 }
  0x4c   :  { %v2202_v22 = vld [vmem:[#allocation9 + $0x4c] sm:$0xf0]  ;;  %v1688_v16 = vor.u32 %v2205_v6, %v1685_v13  ;;  %v2200_v12 = vld [vmem:[#allocation9 + $0x44] sm:$0xf]  ;;  %v1661_v14 = vld [vmem:[#allocation9 + $0x50] sm:$0xf0] }
  0x4d   :  { %411 = vmatpush.bf16.msra.mxu0 %v1692_v10  ;;  %v1667_v19 = vld [vmem:[#allocation9 + $0x48] sm:$0xf]  ;;  %v2203_v18 = vld [vmem:[#allocation9 + $0x54] sm:$0xf0]  ;;  %v2201_v23 = vld [vmem:[#allocation9 + $0x4c] sm:$0xf]  ;;  %v1660_v24 = vor.u32 %v2202_v22, %v1659_v5  ;;  %v1664_v1 = vor.u32 %v2200_v12, %v1661_v14 }
  0x4e   :  { %440 = vmatpush.bf16.msra.mxu1 %v1696_v21  ;;  %v1669_v20 = vld [vmem:[#allocation9 + $0x58] sm:$0xf0]  ;;  %v1643_v10 = vld [vmem:[#allocation9 + $0x20] sm:$0xf]  ;;  %v2198_v4 = vld [vmem:[#allocation9 + $0x2c] sm:$0xf0]  ;;  %v1668_v21 = vor.u32 %v2203_v18, %v1667_v19 }
  0x4f   :  { %469 = vmatpush.bf16.msra.mxu2 %v1700_v8  ;;  %498 = vmatpush.bf16.msra.mxu3 %v1704_v2  ;;  %v1672_v3 = vor.u32 %v2201_v23, %v1669_v20  ;;  %v2196_v8 = vld [vmem:[#allocation9 + $0x24] sm:$0xf]  ;;  %v1645_v2 = vld [vmem:[#allocation9 + $0x30] sm:$0xf0]  ;;  %v1651_v7 = vld [vmem:[#allocation9 + $0x28] sm:$0xf]  ;;  %v1644_v6 = vor.u32 %v2198_v4, %v1643_v10 }
  0x50   :  { %v2199_v17 = vld [vmem:[#allocation9 + $0x34] sm:$0xf0]  ;;  %v2197_v11 = vld [vmem:[#allocation9 + $0x2c] sm:$0xf]  ;;  %v1653_v15 = vld [vmem:[#allocation9 + $0x38] sm:$0xf0]  ;;  %v1648_v13 = vor.u32 %v2196_v8, %v1645_v2 }
  0x51   :  { %412 = vmatpush.bf16.msra.mxu0 %v1676_v27  ;;  %v1627_v27 = vld [vmem:[#allocation9] sm:$0xf]  ;;  %v2194_v5 = vld [vmem:[#allocation9 + $0xc] sm:$0xf0]  ;;  %v1656_v22 = vor.u32 %v2197_v11, %v1653_v15  ;;  %v1635_v12 = vld [vmem:[#allocation9 + $0x8] sm:$0xf] }
  0x52   :  { %441 = vmatpush.bf16.msra.mxu1 %v1680_v31  ;;  %v1652_v31 = vor.u32 %v2199_v17, %v1651_v7  ;;  %v2195_v14 = vld [vmem:[#allocation9 + $0x14] sm:$0xf0]  ;;  %v2193_v19 = vld [vmem:[#allocation9 + $0xc] sm:$0xf]  ;;  %v1637_v18 = vld [vmem:[#allocation9 + $0x18] sm:$0xf0]  ;;  %v1628_v23 = vor.u32 %v2194_v5, %v1627_v27 }
  0x53   :  { %470 = vmatpush.bf16.msra.mxu2 %v1684_v9  ;;  %499 = vmatpush.bf16.msra.mxu3 %v1688_v16  ;;  %v2192_v9 = vld [vmem:[#allocation9 + $0x4] sm:$0xf]  ;;  %v1629_v16 = vld [vmem:[#allocation9 + $0x10] sm:$0xf0]  ;;  %v2257_v4 = vld [vmem:[#allocation6 + $0x8] sm:$0xff] }
  0x54   :  { %v1632_v20 = vor.u32 %v2192_v9, %v1629_v16  ;;  %v2256_v10 = vld [vmem:[#allocation6] sm:$0xff] }
  0x55   :  { %413 = vmatpush.bf16.msra.mxu0 %v1660_v24  ;;  %v1636_v24 = vor.u32 %v2195_v14, %v1635_v12  ;;  %v204_v8 = vld [vmem:[#allocation12] sm:$0xf] }
  0x56   :  { %442 = vmatpush.bf16.msra.mxu1 %v1664_v1  ;;  %v1640_v1 = vor.u32 %v2193_v19, %v1637_v18  ;;  %v2832_v2 = vperm.slane %v204_v8, 0  ;;  %v2834_v7 = vperm.slane %v204_v8, 1  ;;  %v2840_v27 = vperm.slane %v204_v8, 3 }
  0x57   :  { %471 = vmatpush.bf16.msra.mxu2 %v1668_v21  ;;  %500 = vmatpush.bf16.msra.mxu3 %v1672_v3  ;;  %v2258_v21 = vld [vmem:[#allocation6 + $0x10] sm:$0xff]  ;;  %v2259_v3 = vld [vmem:[#allocation6 + $0x18] sm:$0xff] }
  0x59   :  { %414 = vmatpush.bf16.msra.mxu0 %v1644_v6 }
  0x5a   :  { %443 = vmatpush.bf16.msra.mxu1 %v1648_v13  ;;  %v2838_v13 = vperm.slane %v204_v8, 2 }
  0x5b   :  { %472 = vmatpush.bf16.msra.mxu2 %v1652_v31  ;;  %501 = vmatpush.bf16.msra.mxu3 %v1656_v22 }
  0x5d   :  { %415 = vmatpush.bf16.msra.mxu0 %v1628_v23 }
  0x5e   :  { %444 = vmatpush.bf16.msra.mxu1 %v1632_v20 }
  0x5f   :  { %473 = vmatpush.bf16.msra.mxu2 %v1636_v24  ;;  %502 = vmatpush.bf16.msra.mxu3 %v1640_v1 }
  0x60   :  { %416 = vmatmul.bf16.vlgmr.msra.gmra.mxu0 %v2256_v10 }
  0x61   :  { %445 = vmatmul.bf16.vlgmr.msra.gmra.mxu1 %v2256_v10 }
  0x62   :  { %474 = vmatmul.bf16.vlgmr.msra.gmra.mxu2 %v2256_v10  ;;  %503 = vmatmul.bf16.vlgmr.msra.gmra.mxu3 %v2256_v10 }
  0x70   :  { %421 = vmatmul.bf16.gmra.mxu0 %v2257_v4 }
  0x71   :  { %450 = vmatmul.bf16.gmra.mxu1 %v2257_v4 }
  0x72   :  { %479 = vmatmul.bf16.gmra.mxu2 %v2257_v4  ;;  %508 = vmatmul.bf16.gmra.mxu3 %v2257_v4 }
  0x80   :  { %426 = vmatmul.bf16.gmra.mxu0 %v2258_v21 }
  0x81   :  { %455 = vmatmul.bf16.gmra.mxu1 %v2258_v21 }
  0x82   :  { %484 = vmatmul.bf16.gmra.mxu2 %v2258_v21  ;;  %513 = vmatmul.bf16.gmra.mxu3 %v2258_v21 }
  0x90   :  { %431 = vmatmul.bf16.gmra.mxu0 %v2259_v3 }
  0x91   :  { %460 = vmatmul.bf16.gmra.mxu1 %v2259_v3 }
  0x92   :  { %489 = vmatmul.bf16.gmra.mxu2 %v2259_v3  ;;  %518 = vmatmul.bf16.gmra.mxu3 %v2259_v3 }
  0xdd   :  { %v417_v17 = vpop.f32.mrf.mxu0 }
  0xde   :  { %v418_v11 = vadd.f32 %v417_v17, %v2832_v2  ;;  %v446_v15 = vpop.f32.mrf.mxu1 }
  0xdf   :  { %v447_v6 = vadd.f32 %v446_v15, %v2834_v7 }
  0xe0   :  { %524 = vst [vmem:[#allocation2] sm:$0xff] %v418_v11 }
  0xe1   :  { %525 = vst [vmem:[#allocation2 + $0x8] sm:$0xff] %v447_v6 }
  0xe5   :  { %v475_v5 = vpop.f32.mrf.mxu2  ;;  %v504_v31 = vpop.f32.mrf.mxu3 }
  0xe6   :  { %v476_v22 = vadd.f32 %v475_v5, %v2838_v13  ;;  %v505_v9 = vadd.f32 %v504_v31, %v2840_v27  ;;  %v419_v16 = vpop.f32.mrf.mxu0  ;;  %v448_v12 = vpop.f32.mrf.mxu1 }
  0xe7   :  { %v420_v14 = vadd.f32 %v419_v16, %v2832_v2  ;;  %v449_v19 = vadd.f32 %v448_v12, %v2834_v7 }
  0xe8   :  { %526 = vst [vmem:[#allocation2 + $0x10] sm:$0xff] %v476_v22 }
  0xe9   :  { %527 = vst [vmem:[#allocation2 + $0x18] sm:$0xff] %v505_v9 }
  0xea   :  { %528 = vst [vmem:[#allocation2 + $0x20] sm:$0xff] %v420_v14 }
  0xeb   :  { %529 = vst [vmem:[#allocation2 + $0x28] sm:$0xff] %v449_v19 }
  0xed   :  { %v477_v18 = vpop.f32.mrf.mxu2  ;;  %v506_v23 = vpop.f32.mrf.mxu3 }
  0xee   :  { %v478_v20 = vadd.f32 %v477_v18, %v2838_v13  ;;  %v507_v24 = vadd.f32 %v506_v23, %v2840_v27  ;;  %v422_v1 = vpop.f32.mrf.mxu0  ;;  %v451_v10 = vpop.f32.mrf.mxu1 }
  0xef   :  { %v423_v4 = vadd.f32 %v422_v1, %v2832_v2  ;;  %v452_v21 = vadd.f32 %v451_v10, %v2834_v7 }
  0xf0   :  { %530 = vst [vmem:[#allocation2 + $0x30] sm:$0xff] %v478_v20 }
  0xf1   :  { %531 = vst [vmem:[#allocation2 + $0x38] sm:$0xff] %v507_v24 }
  0xf2   :  { %532 = vst [vmem:[#allocation2 + $0x40] sm:$0xff] %v423_v4 }
  0xf3   :  { %533 = vst [vmem:[#allocation2 + $0x48] sm:$0xff] %v452_v21 }
  0xf5   :  { %v480_v3 = vpop.f32.mrf.mxu2  ;;  %v509_v8 = vpop.f32.mrf.mxu3 }
  0xf6   :  { %v481_v17 = vadd.f32 %v480_v3, %v2838_v13  ;;  %v510_v11 = vadd.f32 %v509_v8, %v2840_v27  ;;  %v424_v15 = vpop.f32.mrf.mxu0  ;;  %v453_v6 = vpop.f32.mrf.mxu1 }
  0xf7   :  { %v425_v5 = vadd.f32 %v424_v15, %v2832_v2  ;;  %v454_v31 = vadd.f32 %v453_v6, %v2834_v7 }
  0xf8   :  { %534 = vst [vmem:[#allocation2 + $0x50] sm:$0xff] %v481_v17 }
  0xf9   :  { %535 = vst [vmem:[#allocation2 + $0x58] sm:$0xff] %v510_v11 }
  0xfa   :  { %536 = vst [vmem:[#allocation2 + $0x60] sm:$0xff] %v425_v5 }
  0xfb   :  { %537 = vst [vmem:[#allocation2 + $0x68] sm:$0xff] %v454_v31 }
  0xfd   :  { %v482_v22 = vpop.f32.mrf.mxu2  ;;  %v511_v9 = vpop.f32.mrf.mxu3 }
  0xfe   :  { %v483_v16 = vadd.f32 %v482_v22, %v2838_v13  ;;  %v512_v12 = vadd.f32 %v511_v9, %v2840_v27  ;;  %v427_v14 = vpop.f32.mrf.mxu0  ;;  %v456_v19 = vpop.f32.mrf.mxu1 }
  0xff   :  { %v428_v18 = vadd.f32 %v427_v14, %v2832_v2  ;;  %v457_v23 = vadd.f32 %v456_v19, %v2834_v7 }
 0x100   :  { %538 = vst [vmem:[#allocation2 + $0x70] sm:$0xff] %v483_v16 }
 0x101   :  { %539 = vst [vmem:[#allocation2 + $0x78] sm:$0xff] %v512_v12 }
 0x102   :  { %540 = vst [vmem:[#allocation2 + $0x80] sm:$0xff] %v428_v18 }
 0x103   :  { %541 = vst [vmem:[#allocation2 + $0x88] sm:$0xff] %v457_v23 }
 0x105   :  { %v485_v20 = vpop.f32.mrf.mxu2  ;;  %v514_v24 = vpop.f32.mrf.mxu3 }
 0x106   :  { %v486_v1 = vadd.f32 %v485_v20, %v2838_v13  ;;  %v515_v10 = vadd.f32 %v514_v24, %v2840_v27  ;;  %v429_v4 = vpop.f32.mrf.mxu0  ;;  %v458_v21 = vpop.f32.mrf.mxu1 }
 0x107   :  { %v430_v3 = vadd.f32 %v429_v4, %v2832_v2  ;;  %v459_v8 = vadd.f32 %v458_v21, %v2834_v7 }
 0x108   :  { %542 = vst [vmem:[#allocation2 + $0x90] sm:$0xff] %v486_v1 }
 0x109   :  { %543 = vst [vmem:[#allocation2 + $0x98] sm:$0xff] %v515_v10 }
 0x10a   :  { %544 = vst [vmem:[#allocation2 + $0xa0] sm:$0xff] %v430_v3 }
 0x10b   :  { %545 = vst [vmem:[#allocation2 + $0xa8] sm:$0xff] %v459_v8 }
 0x10d   :  { %v487_v17 = vpop.f32.mrf.mxu2  ;;  %v516_v11 = vpop.f32.mrf.mxu3 }
 0x10e   :  { %v488_v15 = vadd.f32 %v487_v17, %v2838_v13  ;;  %v517_v6 = vadd.f32 %v516_v11, %v2840_v27  ;;  %v432_v5 = vpop.f32.mrf.mxu0  ;;  %v461_v31 = vpop.f32.mrf.mxu1 }
 0x10f   :  { %v433_v22 = vadd.f32 %v432_v5, %v2832_v2  ;;  %v462_v9 = vadd.f32 %v461_v31, %v2834_v7 }
 0x110   :  { %546 = vst [vmem:[#allocation2 + $0xb0] sm:$0xff] %v488_v15 }
 0x111   :  { %547 = vst [vmem:[#allocation2 + $0xb8] sm:$0xff] %v517_v6 }
 0x112   :  { %548 = vst [vmem:[#allocation2 + $0xc0] sm:$0xff] %v433_v22 }
 0x113   :  { %549 = vst [vmem:[#allocation2 + $0xc8] sm:$0xff] %v462_v9 }
 0x115   :  { %v490_v16 = vpop.f32.mrf.mxu2  ;;  %v519_v12 = vpop.f32.mrf.mxu3 }
 0x116   :  { %v491_v14 = vadd.f32 %v490_v16, %v2838_v13  ;;  %v520_v19 = vadd.f32 %v519_v12, %v2840_v27  ;;  %v434_v18 = vpop.f32.mrf.mxu0  ;;  %v463_v23 = vpop.f32.mrf.mxu1 }
 0x117   :  { %v435_v20 = vadd.f32 %v434_v18, %v2832_v2  ;;  %v464_v24 = vadd.f32 %v463_v23, %v2834_v7 }
 0x118   :  { %550 = vst [vmem:[#allocation2 + $0xd0] sm:$0xff] %v491_v14 }
 0x119   :  { %551 = vst [vmem:[#allocation2 + $0xd8] sm:$0xff] %v520_v19 }
 0x11a   :  { %552 = vst [vmem:[#allocation2 + $0xe0] sm:$0xff] %v435_v20 }
 0x11b   :  { %553 = vst [vmem:[#allocation2 + $0xe8] sm:$0xff] %v464_v24 }
 0x11d   :  { %v492_v1 = vpop.f32.mrf.mxu2  ;;  %v521_v10 = vpop.f32.mrf.mxu3 }
 0x11e   :  { %v493_v4 = vadd.f32 %v492_v1, %v2838_v13  ;;  %v522_v21 = vadd.f32 %v521_v10, %v2840_v27 }
 0x120   :  { %554 = vst [vmem:[#allocation2 + $0xf0] sm:$0xff] %v493_v4 }
 0x121   :  { %555 = vst [vmem:[#allocation2 + $0xf8] sm:$0xff] %v522_v21 }
 0x122 LB: > { %v1871_v2 = vor.u32 %v2826_v62, %v2818_v58  ;;  %v1875_v7 = vor.u32 %v2816_v57, %v2824_v61  ;;  %v1879_v13 = vor.u32 %v2830_v0, %v2822_v60  ;;  %v1883_v27 = vor.u32 %v2820_v59, %v2828_v63  ;;  %v3239_v23 = vld [vmem:[#allocation49_spill] sm:$0xff]  ;;  %v3240_v20 = vld [vmem:[#allocation48_spill] sm:$0xff]  ;;  %s1753_s7 = sshll.u32 %s2600_s4, 3  ;;  %s561_s4 = sadd.s32 1, %s2600_s4   ;;  %s2600_s4 = sphi %s2872_s4, %s561_s4  }
 0x123   : > { %v1855_v3 = vor.u32 %v2810_v54, %v2802_v50  ;;  %v1859_v8 = vor.u32 %v2800_v49, %v2808_v53  ;;  %v1863_v17 = vor.u32 %v2814_v56, %v2806_v52  ;;  %v1867_v11 = vor.u32 %v2804_v51, %v2812_v55  ;;  %v3241_v1 = vld [vmem:[#allocation41_spill] sm:$0xff]  ;;  %v3243_v21 = vld [vmem:[#allocation44_spill] sm:$0xff]  ;;  %s2942_s17 = sshra.s32 %s1753_s7, 3  ;;  %p558_p0 = scmp.ge.s32.totalorder %s561_s4, 8  }
 0x124   : > { %735 = vmatpush.bf16.msra.mxu0 %v1871_v2  ;;  %748 = vmatpush.bf16.msra.mxu1 %v1875_v7  ;;  %v1839_v15 = vor.u32 %v2794_v46, %v2786_v42  ;;  %v1843_v6 = vor.u32 %v2784_v41, %v2792_v45  ;;  %v1847_v5 = vor.u32 %v2798_v48, %v2790_v44  ;;  %v3242_v10 = vld [vmem:[#allocation45_spill] sm:$0xff]  ;;  %v3244_v2 = vld [vmem:[#allocation40_spill] sm:$0xff]  ;;  %s2260_s18 = sshll.u32 %s2942_s17, 5  ;;  %s1884_s24 = sshll.u32 %s2942_s17, 2  ;;  %v2967_v0 = vld [vmem:[#allocation15 + $0x20] sm:$0xf] (%p558_p0) }
 0x125   : > { %761 = vmatpush.bf16.msra.mxu2 %v1879_v13  ;;  %774 = vmatpush.bf16.msra.mxu3 %v1883_v27  ;;  %v1851_v31 = vor.u32 %v2788_v43, %v2796_v47  ;;  %v1823_v22 = vor.u32 %v2778_v38, %v2770_v34  ;;  %v1827_v9 = vor.u32 %v2768_v33, %v2776_v37  ;;  %v3245_v13 = vld [vmem:[#allocation43_spill] sm:$0xff]  ;;  %s569_s23 = scalar_lea.vmem [#allocation2], %s2260_s18  ;;  %s816_s3 = scalar_lea.vmem [#allocation3], %s1884_s24  ;;  %v2989_v37 = vld [vmem:[#allocation15 + $0x50] sm:$0xf0] (%p558_p0) }
 0x126   : > { %v1831_v16 = vor.u32 %v2782_v40, %v2774_v36  ;;  %v1835_v12 = vor.u32 %v2772_v35, %v2780_v39  ;;  %v1807_v14 = vor.u32 %v2762_v30, %v2754_v26  ;;  %v1811_v19 = vor.u32 %v2752_v25, %v2760_v29  ;;  %v3246_v27 = vld [vmem:[#allocation47_spill] sm:$0xff]  ;;  %v2969_v25 = vld [vmem:[#allocation15 + $0x2c] sm:$0xf] (%p558_p0)  ;;  %v2971_v26 = vld [vmem:[#allocation15 + $0x28] sm:$0xf] (%p558_p0)  ;;  %3285 = vst [vmem:[#allocation44_spill] sm:$0xff] (%p558_p0), %v2989_v37 }
 0x127   : > { %v1815_v18 = vor.u32 %v2766_v32, %v2758_v28  ;;  %v1819_v24 = vor.u32 %v3240_v20, %v3239_v23  ;;  %v1791_v4 = vor.u32 %v3242_v10, %v3241_v1  ;;  %v1795_v7 = vor.u32 %v3244_v2, %v3243_v21  ;;  %v3257_v20 = vld [vmem:[#allocation25_spill] sm:$0xff]  ;;  %v3259_v10 = vld [vmem:[#allocation28_spill] sm:$0xff]  ;;  %v2977_v30 = vld [vmem:[#allocation15 + $0x38] sm:$0xf0] (%p558_p0) }
 0x128   : > { %736 = vmatpush.bf16.msra.mxu0 %v1855_v3  ;;  %749 = vmatpush.bf16.msra.mxu1 %v1859_v8  ;;  %v1799_v3 = vor.u32 %v3246_v27, %v3245_v13  ;;  %v3247_v8 = vld [vmem:[#allocation46_spill] sm:$0xff]  ;;  %v563_v2 = vld [vmem:[#allocation4] sm:$0xff]  ;;  %v3262_v13 = vld [vmem:[#allocation31_spill] sm:$0xff] }
 0x129   : > { %762 = vmatpush.bf16.msra.mxu2 %v1863_v17  ;;  %775 = vmatpush.bf16.msra.mxu3 %v1867_v11  ;;  %v3248_v17 = vld [vmem:[#allocation42_spill] sm:$0xff]  ;;  %v2973_v28 = vld [vmem:[#allocation15 + $0x30] sm:$0xf0] (%p558_p0)  ;;  %v2975_v29 = vld [vmem:[#allocation15 + $0x2c] sm:$0xf0] (%p558_p0) }
 0x12a   : > { %v1803_v11 = vor.u32 %v3248_v17, %v3247_v8  ;;  %v3264_v8 = vld [vmem:[#allocation26_spill] sm:$0xff]  ;;  %v2981_v33 = vld [vmem:[#allocation15 + $0x44] sm:$0xf] (%p558_p0)  ;;  %v2983_v34 = vld [vmem:[#allocation15 + $0x40] sm:$0xf] (%p558_p0) }
 0x12b   :  { %v2979_v32 = vld [vmem:[#allocation15 + $0x34] sm:$0xf0] (%p558_p0)  ;;  %3281 = vst [vmem:[#allocation40_spill] sm:$0xff] (%p558_p0), %v2981_v33  ;;  %v2985_v35 = vld [vmem:[#allocation15 + $0x4c] sm:$0xf] (%p558_p0) }
 0x12c   : > { %737 = vmatpush.bf16.msra.mxu0 %v1839_v15  ;;  %750 = vmatpush.bf16.msra.mxu1 %v1843_v6  ;;  %v3249_v15 = vld [vmem:[#allocation33_spill] sm:$0xff]  ;;  %3282 = vst [vmem:[#allocation41_spill] sm:$0xff] (%p558_p0), %v2983_v34  ;;  %v2987_v36 = vld [vmem:[#allocation15 + $0x48] sm:$0xf] (%p558_p0)  ;;  %v2993_v39 = vld [vmem:[#allocation15 + $0x58] sm:$0xf0] (%p558_p0) }
 0x12d   : > { %763 = vmatpush.bf16.msra.mxu2 %v1847_v5  ;;  %776 = vmatpush.bf16.msra.mxu3 %v1851_v31  ;;  %v3250_v6 = vld [vmem:[#allocation37_spill] sm:$0xff]  ;;  %v3251_v31 = vld [vmem:[#allocation36_spill] sm:$0xff]  ;;  %3274 = vst [vmem:[#allocation33_spill] sm:$0xff] (%p558_p0), %v2967_v0  ;;  %v2995_v40 = vld [vmem:[#allocation15 + $0x54] sm:$0xf0] (%p558_p0) }
 0x12e   : > { %v1775_v5 = vor.u32 %v3250_v6, %v3249_v15  ;;  %v570_v15 = vld [vmem:[%s569_s23] sm:$0xff]  ;;  %v571_v6 = vld [vmem:[%s569_s23 + $0x8] sm:$0xff]  ;;  %3277 = vst [vmem:[#allocation36_spill] sm:$0xff] (%p558_p0), %v2973_v28  ;;  %v2997_v41 = vld [vmem:[#allocation15 + $0x64] sm:$0xf] (%p558_p0) }
 0x12f   :  { %3278 = vst [vmem:[#allocation37_spill] sm:$0xff] (%p558_p0), %v2975_v29  ;;  %v2991_v38 = vld [vmem:[#allocation15 + $0x4c] sm:$0xf0] (%p558_p0)  ;;  %v2999_v42 = vld [vmem:[#allocation15 + $0x60] sm:$0xf] (%p558_p0) }
 0x130   : > { %738 = vmatpush.bf16.msra.mxu0 %v1823_v22  ;;  %751 = vmatpush.bf16.msra.mxu1 %v1827_v9  ;;  %v3252_v22 = vld [vmem:[#allocation32_spill] sm:$0xff]  ;;  %3283 = vst [vmem:[#allocation42_spill] sm:$0xff] (%p558_p0), %v2985_v35  ;;  %v3005_v45 = vld [vmem:[#allocation15 + $0x70] sm:$0xf0] (%p558_p0)  ;;  %v3007_v46 = vld [vmem:[#allocation15 + $0x6c] sm:$0xf0] (%p558_p0) }
 0x131   : > { %764 = vmatpush.bf16.msra.mxu2 %v1831_v16  ;;  %777 = vmatpush.bf16.msra.mxu3 %v1835_v12  ;;  %v1779_v9 = vor.u32 %v3252_v22, %v3251_v31  ;;  %v3253_v16 = vld [vmem:[#allocation35_spill] sm:$0xff]  ;;  %3284 = vst [vmem:[#allocation43_spill] sm:$0xff] (%p558_p0), %v2987_v36  ;;  %v3001_v43 = vld [vmem:[#allocation15 + $0x6c] sm:$0xf] (%p558_p0)  ;;  %v3003_v44 = vld [vmem:[#allocation15 + $0x68] sm:$0xf] (%p558_p0) }
 0x132   : > { %v3254_v12 = vld [vmem:[#allocation39_spill] sm:$0xff]  ;;  %3276 = vst [vmem:[#allocation35_spill] sm:$0xff] (%p558_p0), %v2971_v26  ;;  %v3009_v47 = vld [vmem:[#allocation15 + $0x78] sm:$0xf0] (%p558_p0)  ;;  %v3011_v48 = vld [vmem:[#allocation15 + $0x74] sm:$0xf0] (%p558_p0) }
 0x133   :  { %3280 = vst [vmem:[#allocation39_spill] sm:$0xff] (%p558_p0), %v2979_v32  ;;  %v3013_v49 = vld [vmem:[#allocation15 + $0x84] sm:$0xf] (%p558_p0)  ;;  %v3015_v50 = vld [vmem:[#allocation15 + $0x80] sm:$0xf] (%p558_p0) }
 0x134   : > { %739 = vmatpush.bf16.msra.mxu0 %v1807_v14  ;;  %752 = vmatpush.bf16.msra.mxu1 %v1811_v19  ;;  %v1783_v14 = vor.u32 %v3254_v12, %v3253_v16  ;;  %v3255_v19 = vld [vmem:[#allocation38_spill] sm:$0xff]  ;;  %3286 = vst [vmem:[#allocation45_spill] sm:$0xff] (%p558_p0), %v2991_v38  ;;  %v3017_v51 = vld [vmem:[#allocation15 + $0x8c] sm:$0xf] (%p558_p0)  ;;  %v3019_v52 = vld [vmem:[#allocation15 + $0x88] sm:$0xf] (%p558_p0) }
 0x135   : > { %765 = vmatpush.bf16.msra.mxu2 %v1815_v18  ;;  %778 = vmatpush.bf16.msra.mxu3 %v1819_v24  ;;  %v3256_v18 = vld [vmem:[#allocation34_spill] sm:$0xff]  ;;  %v3258_v24 = vld [vmem:[#allocation29_spill] sm:$0xff]  ;;  %3279 = vst [vmem:[#allocation38_spill] sm:$0xff] (%p558_p0), %v2977_v30  ;;  %v3029_v57 = vld [vmem:[#allocation15 + $0xa4] sm:$0xf] (%p558_p0) }
 0x136   : > { %v1787_v23 = vor.u32 %v3256_v18, %v3255_v19  ;;  %v1759_v1 = vor.u32 %v3258_v24, %v3257_v20  ;;  %v573_v19 = vld [vmem:[%s569_s23 + $0x18] sm:$0xff]  ;;  %3275 = vst [vmem:[#allocation34_spill] sm:$0xff] (%p558_p0), %v2969_v25  ;;  %v3021_v53 = vld [vmem:[#allocation15 + $0x90] sm:$0xf0] (%p558_p0)  ;;  %v3023_v54 = vld [vmem:[#allocation15 + $0x8c] sm:$0xf0] (%p558_p0) }
 0x137   :  { %3287 = vst [vmem:[#allocation46_spill] sm:$0xff] (%p558_p0), %v2993_v39  ;;  %v3025_v55 = vld [vmem:[#allocation15 + $0x98] sm:$0xf0] (%p558_p0)  ;;  %v3027_v56 = vld [vmem:[#allocation15 + $0x94] sm:$0xf0] (%p558_p0) }
 0x138   : > { %740 = vmatpush.bf16.msra.mxu0 %v1791_v4  ;;  %753 = vmatpush.bf16.msra.mxu1 %v1795_v7  ;;  %v3260_v4 = vld [vmem:[#allocation24_spill] sm:$0xff]  ;;  %v3261_v7 = vld [vmem:[#allocation27_spill] sm:$0xff]  ;;  %3288 = vst [vmem:[#allocation47_spill] sm:$0xff] (%p558_p0), %v2995_v40  ;;  %v3037_v61 = vld [vmem:[#allocation15 + $0xb0] sm:$0xf0] (%p558_p0) }
 0x139   : > { %766 = vmatpush.bf16.msra.mxu2 %v1799_v3  ;;  %779 = vmatpush.bf16.msra.mxu3 %v1803_v11  ;;  %v1763_v21 = vor.u32 %v3260_v4, %v3259_v10  ;;  %v1767_v27 = vor.u32 %v3262_v13, %v3261_v7  ;;  %v3263_v3 = vld [vmem:[#allocation30_spill] sm:$0xff]  ;;  %v574_v11 = vpack.c.bf16 %v563_v2, %v563_v2  ;;  %v3031_v58 = vld [vmem:[#allocation15 + $0xa0] sm:$0xf] (%p558_p0)  ;;  %v3033_v59 = vld [vmem:[#allocation15 + $0xac] sm:$0xf] (%p558_p0) }
 0x13a   : > { %v1771_v17 = vor.u32 %v3264_v8, %v3263_v3  ;;  %v564_v3 = vld [vmem:[#allocation5] sm:$0xff]  ;;  %3289 = vst [vmem:[#allocation48_spill] sm:$0xff] (%p558_p0), %v3001_v43  ;;  %v3035_v60 = vld [vmem:[#allocation15 + $0xa8] sm:$0xf] (%p558_p0)  ;;  %v3039_v62 = vld [vmem:[#allocation15 + $0xac] sm:$0xf0] (%p558_p0) }
 0x13b   :  { %v3041_v63 = vld [vmem:[#allocation15 + $0xb8] sm:$0xf0] (%p558_p0)  ;;  %v1999_v30 = vld [vmem:[#allocation14 + $0xc0] sm:$0xf] (%p558_p0)  ;;  %v2287_v26 = vld [vmem:[#allocation14 + $0xcc] sm:$0xf0] (%p558_p0) }
 0x13c   : > { %741 = vmatpush.bf16.msra.mxu0 %v1775_v5  ;;  %754 = vmatpush.bf16.msra.mxu1 %v1779_v9  ;;  %v2025_v25 = vld [vmem:[#allocation14 + $0xf8] sm:$0xf0] (%p558_p0)  ;;  %v2001_v28 = vld [vmem:[#allocation14 + $0xd0] sm:$0xf0] (%p558_p0)  ;;  %v2000_v29 = vor.u32 (%p558_p0), %v2287_v26, %v1999_v30  ;;  %v2007_v35 = vld [vmem:[#allocation14 + $0xc8] sm:$0xf] (%p558_p0) }
 0x13d   : > { %767 = vmatpush.bf16.msra.mxu2 %v1783_v14  ;;  %780 = vmatpush.bf16.msra.mxu3 %v1787_v23  ;;  %v572_v14 = vld [vmem:[%s569_s23 + $0x10] sm:$0xff]  ;;  %v2288_v39 = vld [vmem:[#allocation14 + $0xd4] sm:$0xf0] (%p558_p0)  ;;  %v2286_v40 = vld [vmem:[#allocation14 + $0xcc] sm:$0xf] (%p558_p0) }
 0x13e   :  { %v2283_v36 = vld [vmem:[#allocation14 + $0xac] sm:$0xf0] (%p558_p0)  ;;  %v2281_v33 = vld [vmem:[#allocation14 + $0xa4] sm:$0xf] (%p558_p0)  ;;  %v2284_v37 = vld [vmem:[#allocation14 + $0xb4] sm:$0xf0] (%p558_p0) }
 0x13f   :  { %v1993_v26 = vld [vmem:[#allocation14 + $0xb8] sm:$0xf0] (%p558_p0)  ;;  %v2279_v30 = vld [vmem:[#allocation14 + $0x8c] sm:$0xf0] (%p558_p0)  ;;  %v1975_v38 = vld [vmem:[#allocation14 + $0x88] sm:$0xf] (%p558_p0) }
 0x140   : > { %742 = vmatpush.bf16.msra.mxu0 %v1759_v1  ;;  %755 = vmatpush.bf16.msra.mxu1 %v1763_v21  ;;  %v1959_v34 = vld [vmem:[#allocation14 + $0x68] sm:$0xf] (%p558_p0)  ;;  %v1961_v43 = vld [vmem:[#allocation14 + $0x78] sm:$0xf0] (%p558_p0) }
 0x141   : > { %768 = vmatpush.bf16.msra.mxu2 %v1767_v27  ;;  %781 = vmatpush.bf16.msra.mxu3 %v1771_v17 }
 0x143   : > { %743 = vmatmul.bf16.vlgmr.msra.gmra.mxu0 %v574_v11  ;;  %756 = vmatmul.bf16.vlgmr.msra.gmra.mxu1 %v574_v11 }
 0x144   : > { %769 = vmatmul.bf16.vlgmr.msra.gmra.mxu2 %v574_v11  ;;  %782 = vmatmul.bf16.vlgmr.msra.gmra.mxu3 %v574_v11 }
 0x1c0   : > { %v744_v5 = vpop.f32.mrf.mxu0  ;;  %v757_v31 = vpop.f32.mrf.mxu1 }
 0x1c1   : > { %v787_v22 = vadd.f32 %v744_v5, %v570_v15  ;;  %v788_v9 = vadd.f32 %v757_v31, %v571_v6 }
 0x1c3   : > { %v791_v16 = vmul.f32 0.5, %v787_v22  ;;  %v792_v12 = vmul.f32 0.5, %v788_v9 }
 0x1c5   : > { %2367 = vtanh.f32 %v791_v16 }
 0x1c6   : > { %2369 = vtanh.f32 %v792_v12 }
 0x1c7   : > { %v770_v18 = vpop.f32.mrf.mxu2  ;;  %v783_v23 = vpop.f32.mrf.mxu3 }
 0x1c8   : > { %v789_v20 = vadd.f32 %v770_v18, %v572_v14  ;;  %v790_v24 = vadd.f32 %v783_v23, %v573_v19  ;;  %v746_v1 = vpop.f32.mrf.mxu0  ;;  %v759_v10 = vpop.f32.mrf.mxu1  ;;  %v2015_v18 = vld [vmem:[#allocation14 + $0xe0] sm:$0xf] (%p558_p0)  ;;  %v2291_v23 = vld [vmem:[#allocation14 + $0xec] sm:$0xf0] (%p558_p0) }
 0x1c9   :  { %v2953_v1 = vld [vmem:[#allocation15 + $0xc] sm:$0xf] (%p558_p0)  ;;  %v2955_v10 = vld [vmem:[#allocation15 + $0x8] sm:$0xf] (%p558_p0) }
 0x1ca   : > { %v793_v4 = vmul.f32 0.5, %v789_v20  ;;  %2371 = vtanh.f32 %v790_v24  ;;  %v2949_v20 = vld [vmem:[#allocation15 + $0x4] sm:$0xf] (%p558_p0)  ;;  %v2951_v24 = vld [vmem:[#allocation15] sm:$0xf] (%p558_p0)  ;;  %3267 = vst [vmem:[#allocation26_spill] sm:$0xff] (%p558_p0), %v2953_v1 }
 0x1cb   : > { %v2368_v21 = vpop.eup %2367  ;;  %3265 = vst [vmem:[#allocation24_spill] sm:$0xff] (%p558_p0), %v2949_v20  ;;  %v3290_v1 = vmov (%p558_p0), 0.0   ;;  %v2023_v20 = vld [vmem:[#allocation14 + $0xe8] sm:$0xf] (%p558_p0) }
 0x1cc   : > { %v2370_v2 = vpop.eup %2369  ;;  %v797_v7 = vmul.f32 0.5, %v2368_v21  ;;  %2373 = vtanh.f32 %v793_v4  ;;  %3266 = vst [vmem:[#allocation25_spill] sm:$0xff] (%p558_p0), %v2951_v24  ;;  %v2016_v4 = vor.u32 (%p558_p0), %v2291_v23, %v2015_v18  ;;  %v2957_v21 = vld [vmem:[#allocation15 + $0x10] sm:$0xf0] (%p558_p0)  ;;  %v3071_v18 = vld [vmem:[#allocation15 + $0xec] sm:$0xf0] (%p558_p0) }
 0x1cd   : > { %v798_v13 = vmul.f32 0.5, %v2370_v2  ;;  %3268 = vst [vmem:[#allocation27_spill] sm:$0xff] (%p558_p0), %v2955_v10  ;;  %v2959_v2 = vld [vmem:[#allocation15 + $0xc] sm:$0xf0] (%p558_p0)  ;;  %v3073_v23 = vld [vmem:[#allocation15 + $0xf8] sm:$0xf0] (%p558_p0) }
 0x1ce   : > { %v800_v27 = vadd.f32 0.5, %v797_v7  ;;  %3269 = vst [vmem:[#allocation28_spill] sm:$0xff] (%p558_p0), %v2957_v21  ;;  %v2961_v7 = vld [vmem:[#allocation15 + $0x18] sm:$0xf0] (%p558_p0)  ;;  %1086 = vmatpush.bf16.msra.mxu0 (%p558_p0), %v2016_v4  ;;  %v3075_v4 = vld [vmem:[#allocation15 + $0xf4] sm:$0xf0] (%p558_p0) }
 0x1cf   : > { %v801_v8 = vadd.f32 0.5, %v798_v13  ;;  %v772_v17 = vpop.f32.mrf.mxu2  ;;  %v785_v11 = vpop.f32.mrf.mxu3  ;;  %3270 = vst [vmem:[#allocation29_spill] sm:$0xff] (%p558_p0), %v2959_v2  ;;  %v2963_v13 = vld [vmem:[#allocation15 + $0x14] sm:$0xf0] (%p558_p0)  ;;  %v2290_v24 = vld [vmem:[#allocation14 + $0xec] sm:$0xf] (%p558_p0) }
 0x1d0   : > { %v2372_v15 = vpop.eup %2371  ;;  %3271 = vst [vmem:[#allocation30_spill] sm:$0xff] (%p558_p0), %v2961_v7  ;;  %v3047_v17 = vld [vmem:[#allocation15 + $0xc0] sm:$0xf] (%p558_p0)  ;;  %v3049_v11 = vld [vmem:[#allocation15 + $0xcc] sm:$0xf] (%p558_p0)  ;;  %v2028_v32 = vor.u32 (%p558_p0), %v2290_v24, %v2025_v25 }
 0x1d1   : > { %v804_v6 = vmul.f32 %v801_v8, %v564_v3  ;;  %v805_v5 = vmul.f32 %v2372_v15, %v800_v27  ;;  %3272 = vst [vmem:[#allocation31_spill] sm:$0xff] (%p558_p0), %v2963_v13  ;;  %v2965_v27 = vld [vmem:[#allocation15 + $0x24] sm:$0xf] (%p558_p0)  ;;  %v3043_v3 = vld [vmem:[#allocation15 + $0xb4] sm:$0xf0] (%p558_p0) }
 0x1d2   : > { %v2374_v31 = vpop.eup %2373  ;;  %3273 = vst [vmem:[#allocation32_spill] sm:$0xff] (%p558_p0), %v2965_v27  ;;  %v3045_v8 = vld [vmem:[#allocation15 + $0xc4] sm:$0xf] (%p558_p0)  ;;  %v3051_v15 = vld [vmem:[#allocation15 + $0xc8] sm:$0xf] (%p558_p0)  ;;  %1173 = vmatpush.bf16.msra.mxu3 (%p558_p0), %v2028_v32  ;;  %1087 = vmatpush.bf16.msra.mxu0 (%p558_p0), %v2000_v29 }
 0x1d3   : > { %v806_v22 = vadd.f32 %v805_v5, %v804_v6  ;;  %v799_v9 = vmul.f32 0.5, %v2374_v31  ;;  %v3053_v6 = vld [vmem:[#allocation15 + $0xd0] sm:$0xf0] (%p558_p0)  ;;  %v3055_v5 = vld [vmem:[#allocation15 + $0xcc] sm:$0xf0] (%p558_p0) }
 0x1d4   :  { %v3057_v31 = vld [vmem:[#allocation15 + $0xd8] sm:$0xf0] (%p558_p0)  ;;  %v2289_v7 = vld [vmem:[#allocation14 + $0xe4] sm:$0xf] (%p558_p0)  ;;  %v2017_v13 = vld [vmem:[#allocation14 + $0xf0] sm:$0xf0] (%p558_p0) }
 0x1d5   : > { %2375 = vtanh.f32 %v806_v22  ;;  %810 = vst [vmem:[#allocation5] sm:$0xff] %v806_v22  ;;  %v802_v16 = vadd.f32 0.5, %v799_v9  ;;  %v3059_v22 = vld [vmem:[#allocation15 + $0xd4] sm:$0xf0] (%p558_p0)  ;;  %v3061_v9 = vld [vmem:[#allocation15 + $0xe4] sm:$0xf] (%p558_p0)  ;;  %v2020_v10 = vor.u32 (%p558_p0), %v2289_v7, %v2017_v13 }
 0x1d6   :  { %884 = vst [vmem:[#allocation5] sm:$0xff] (%p558_p0), %v3290_v1  ;;  %v2292_v21 = vld [vmem:[#allocation14 + $0xf4] sm:$0xf0] (%p558_p0)  ;;  %v2285_v27 = vld [vmem:[#allocation14 + $0xc4] sm:$0xf] (%p558_p0) }
 0x1d7   :  { %v2024_v2 = vor.u32 (%p558_p0), %v2292_v21, %v2023_v20  ;;  %1115 = vmatpush.bf16.msra.mxu1 (%p558_p0), %v2020_v10  ;;  %v2004_v0 = vor.u32 (%p558_p0), %v2285_v27, %v2001_v28  ;;  %v2009_v7 = vld [vmem:[#allocation14 + $0xd8] sm:$0xf0] (%p558_p0)  ;;  %v1983_v13 = vld [vmem:[#allocation14 + $0xa0] sm:$0xf] (%p558_p0)  ;;  %v1985_v10 = vld [vmem:[#allocation14 + $0xb0] sm:$0xf0] (%p558_p0) }
 0x1d8   :  { %v2012_v20 = vor.u32 (%p558_p0), %v2286_v40, %v2009_v7  ;;  %v1984_v21 = vor.u32 (%p558_p0), %v2283_v36, %v1983_v13  ;;  %v1991_v24 = vld [vmem:[#allocation14 + $0xa8] sm:$0xf] (%p558_p0)  ;;  %v1988_v25 = vor.u32 (%p558_p0), %v2281_v33, %v1985_v10  ;;  %v1967_v28 = vld [vmem:[#allocation14 + $0x80] sm:$0xf] (%p558_p0)  ;;  %v2277_v32 = vld [vmem:[#allocation14 + $0x84] sm:$0xf] (%p558_p0) }
 0x1d9   :  { %1144 = vmatpush.bf16.msra.mxu2 (%p558_p0), %v2024_v2  ;;  %v2282_v2 = vld [vmem:[#allocation14 + $0xac] sm:$0xf] (%p558_p0)  ;;  %v1992_v27 = vor.u32 (%p558_p0), %v2284_v37, %v1991_v24  ;;  %v2280_v29 = vld [vmem:[#allocation14 + $0x94] sm:$0xf0] (%p558_p0)  ;;  %v1968_v36 = vor.u32 (%p558_p0), %v2279_v30, %v1967_v28  ;;  %v1977_v7 = vld [vmem:[#allocation14 + $0x98] sm:$0xf0] (%p558_p0) }
 0x1da   :  { %1174 = vmatpush.bf16.msra.mxu3 (%p558_p0), %v2012_v20  ;;  %1088 = vmatpush.bf16.msra.mxu0 (%p558_p0), %v1984_v21  ;;  %v2278_v40 = vld [vmem:[#allocation14 + $0x8c] sm:$0xf] (%p558_p0)  ;;  %v1951_v33 = vld [vmem:[#allocation14 + $0x60] sm:$0xf] (%p558_p0)  ;;  %v2275_v13 = vld [vmem:[#allocation14 + $0x6c] sm:$0xf0] (%p558_p0)  ;;  %v1976_v10 = vor.u32 (%p558_p0), %v2280_v29, %v1975_v38 }
 0x1db   : > { %v2376_v12 = vpop.eup %2375  ;;  %1116 = vmatpush.bf16.msra.mxu1 (%p558_p0), %v2004_v0  ;;  %v1953_v37 = vld [vmem:[#allocation14 + $0x70] sm:$0xf0] (%p558_p0)  ;;  %v1980_v24 = vor.u32 (%p558_p0), %v2278_v40, %v1977_v7  ;;  %v2276_v20 = vld [vmem:[#allocation14 + $0x74] sm:$0xf0] (%p558_p0)  ;;  %v1935_v28 = vld [vmem:[#allocation14 + $0x40] sm:$0xf] (%p558_p0) }
 0x1dc   : > { %v808_v14 = vmul.f32 %v2376_v12, %v802_v16  ;;  %560 = sbr.rel (!%p558_p0) target bundleno = 290 (0x122), region = 101  ;;  %v3063_v16 = vld [vmem:[#allocation15 + $0xe0] sm:$0xf] (%p558_p0)  ;;  %v3065_v12 = vld [vmem:[#allocation15 + $0xec] sm:$0xf] (%p558_p0) }
 0x1dd   :  { %v2271_v30 = vld [vmem:[#allocation14 + $0x4c] sm:$0xf0] (%p558_p0)  ;;  %v2272_v29 = vld [vmem:[#allocation14 + $0x54] sm:$0xf0] (%p558_p0)  ;;  %v2270_v40 = vld [vmem:[#allocation14 + $0x4c] sm:$0xf] (%p558_p0) }
 0x1de   : > { %809 = vst [vmem:[#allocation4] sm:$0xff] %v808_v14  ;;  %v811_v19 = vpack.c.bf16 %v808_v14, %v808_v14  ;;  %v3067_v14 = vld [vmem:[#allocation15 + $0xe8] sm:$0xf] (%p558_p0)  ;;  %1089 = vmatpush.bf16.msra.mxu0 (%p558_p0), %v1968_v36  ;;  %v1945_v7 = vld [vmem:[#allocation14 + $0x58] sm:$0xf0] (%p558_p0) }
 0x1df   :  { %883 = vst [vmem:[#allocation4] sm:$0xff] (%p558_p0), %v3290_v1  ;;  %v2008_v1 = vor.u32 (%p558_p0), %v2288_v39, %v2007_v35  ;;  %v1996_v35 = vor.u32 (%p558_p0), %v2282_v2, %v1993_v26  ;;  %v1969_v39 = vld [vmem:[#allocation14 + $0x90] sm:$0xf0] (%p558_p0)  ;;  %1117 = vmatpush.bf16.msra.mxu1 (%p558_p0), %v1988_v25  ;;  %v1952_v2 = vor.u32 (%p558_p0), %v2275_v13, %v1951_v33  ;;  %v2274_v26 = vld [vmem:[#allocation14 + $0x6c] sm:$0xf] (%p558_p0) }
 0x1e0   : > { %817 = vst [vmem:[%s816_s3] sm:$0xf] %v811_v19  ;;  %v3069_v19 = vld [vmem:[#allocation15 + $0xf0] sm:$0xf0] (%p558_p0)  ;;  %v1972_v0 = vor.u32 (%p558_p0), %v2277_v32, %v1969_v39  ;;  %v1960_v25 = vor.u32 (%p558_p0), %v2276_v20, %v1959_v34  ;;  %v2269_v32 = vld [vmem:[#allocation14 + $0x44] sm:$0xf] (%p558_p0)  ;;  %v1964_v38 = vor.u32 (%p558_p0), %v2274_v26, %v1961_v43  ;;  %v1948_v34 = vor.u32 (%p558_p0), %v2270_v40, %v1945_v7 }
 0x1e1   :  { %1145 = vmatpush.bf16.msra.mxu2 %v2008_v1  ;;  %v2273_v1 = vld [vmem:[#allocation14 + $0x64] sm:$0xf]  ;;  %1175 = vmatpush.bf16.msra.mxu3 %v1996_v35  ;;  %v1937_v39 = vld [vmem:[#allocation14 + $0x50] sm:$0xf0]  ;;  %v1936_v35 = vor.u32 %v2271_v30, %v1935_v28  ;;  %v1919_v33 = vld [vmem:[#allocation14 + $0x20] sm:$0xf] }
 0x1e2   :  { %v1956_v21 = vor.u32 %v2273_v1, %v1953_v37  ;;  %1090 = vmatpush.bf16.msra.mxu0 %v1952_v2  ;;  %v1940_v36 = vor.u32 %v2269_v32, %v1937_v39  ;;  %v2267_v13 = vld [vmem:[#allocation14 + $0x2c] sm:$0xf0]  ;;  %v2265_v1 = vld [vmem:[#allocation14 + $0x24] sm:$0xf]  ;;  %v1921_v37 = vld [vmem:[#allocation14 + $0x30] sm:$0xf0] }
 0x1e3   :  { %1118 = vmatpush.bf16.msra.mxu1 %v1972_v0  ;;  %v2268_v20 = vld [vmem:[#allocation14 + $0x34] sm:$0xf0]  ;;  %v1920_v43 = vor.u32 %v2267_v13, %v1919_v33  ;;  %v1929_v26 = vld [vmem:[#allocation14 + $0x38] sm:$0xf0]  ;;  %v1924_v2 = vor.u32 %v2265_v1, %v1921_v37  ;;  %v1903_v28 = vld [vmem:[#allocation14] sm:$0xf] }
 0x1e4   :  { %v2263_v30 = vld [vmem:[#allocation14 + $0xc] sm:$0xf0]  ;;  %v2261_v32 = vld [vmem:[#allocation14 + $0x4] sm:$0xf]  ;;  %v1905_v39 = vld [vmem:[#allocation14 + $0x10] sm:$0xf0] }
 0x1e5   :  { %1146 = vmatpush.bf16.msra.mxu2 %v1992_v27  ;;  %1176 = vmatpush.bf16.msra.mxu3 %v1980_v24  ;;  %v1943_v27 = vld [vmem:[#allocation14 + $0x48] sm:$0xf]  ;;  %v2266_v24 = vld [vmem:[#allocation14 + $0x2c] sm:$0xf]  ;;  %v1913_v7 = vld [vmem:[#allocation14 + $0x18] sm:$0xf0] }
 0x1e6   :  { %v1944_v0 = vor.u32 %v2272_v29, %v1943_v27  ;;  %1091 = vmatpush.bf16.msra.mxu0 %v1936_v35  ;;  %v1911_v27 = vld [vmem:[#allocation14 + $0x8] sm:$0xf]  ;;  %v2264_v29 = vld [vmem:[#allocation14 + $0x14] sm:$0xf0]  ;;  %v2262_v40 = vld [vmem:[#allocation14 + $0xc] sm:$0xf]  ;;  %v1908_v35 = vor.u32 %v2261_v32, %v1905_v39 }
 0x1e7   :  { %1119 = vmatpush.bf16.msra.mxu1 %v1956_v21  ;;  %v1912_v33 = vor.u32 %v2264_v29, %v1911_v27  ;;  %v2325_v13 = vld [vmem:[#allocation3] sm:$0xff]  ;;  %v2327_v1 = vld [vmem:[#allocation3 + $0x10] sm:$0xff]  ;;  %v2328_v37 = vld [vmem:[#allocation3 + $0x18] sm:$0xff] }
 0x1e9   :  { %1147 = vmatpush.bf16.msra.mxu2 %v1976_v10  ;;  %1177 = vmatpush.bf16.msra.mxu3 %v1964_v38  ;;  %v1927_v10 = vld [vmem:[#allocation14 + $0x28] sm:$0xf]  ;;  %v1904_v38 = vor.u32 %v2263_v30, %v1903_v28 }
 0x1ea   :  { %v1928_v21 = vor.u32 %v2268_v20, %v1927_v10  ;;  %1092 = vmatpush.bf16.msra.mxu0 %v1920_v43 }
 0x1eb   :  { %1120 = vmatpush.bf16.msra.mxu1 %v1940_v36  ;;  %v1916_v36 = vor.u32 %v2262_v40, %v1913_v7 }
 0x1ed   :  { %1148 = vmatpush.bf16.msra.mxu2 %v1960_v25  ;;  %1178 = vmatpush.bf16.msra.mxu3 %v1948_v34  ;;  %v1932_v25 = vor.u32 %v2266_v24, %v1929_v26  ;;  %v882_v34 = vld [vmem:[%s3207_s6] sm:$0xf]  ;;  %s3122_s6 = smov 0  }
 0x1ee   :  { %1093 = vmatpush.bf16.msra.mxu0 %v1904_v38  ;;  %v3082_v10 = vperm.slane %v882_v34, 0  ;;  %v3084_v20 = vperm.slane %v882_v34, 1  ;;  %v3088_v28 = vperm.slane %v882_v34, 2  ;;  %v3090_v30 = vperm.slane %v882_v34, 3 }
 0x1ef   :  { %1121 = vmatpush.bf16.msra.mxu1 %v1924_v2 }
 0x1f1   :  { %1149 = vmatpush.bf16.msra.mxu2 %v1944_v0  ;;  %1179 = vmatpush.bf16.msra.mxu3 %v1932_v25  ;;  %v2326_v0 = vld [vmem:[#allocation3 + $0x8] sm:$0xff] }
 0x1f2   :  { %1094 = vmatmul.bf16.vlgmr.msra.gmra.mxu0 %v2325_v13 }
 0x1f3   :  { %1122 = vmatpush.bf16.msra.mxu1 %v1908_v35 }
 0x1f5   :  { %1150 = vmatpush.bf16.msra.mxu2 %v1928_v21  ;;  %1180 = vmatpush.bf16.msra.mxu3 %v1916_v36 }
 0x1f6   :  { %1123 = vmatmul.bf16.vlgmr.msra.gmra.mxu1 %v2325_v13 }
 0x1f8   :  { %1181 = vmatmul.bf16.vlgmr.msra.gmra.mxu3 %v2325_v13 }
 0x1f9   :  { %1151 = vmatpush.bf16.msra.mxu2 %v1912_v33 }
 0x1fc   :  { %1152 = vmatmul.bf16.vlgmr.msra.gmra.mxu2 %v2325_v13 }
 0x202   :  { %1099 = vmatmul.bf16.gmra.mxu0 %v2326_v0 }
 0x206   :  { %1128 = vmatmul.bf16.gmra.mxu1 %v2326_v0 }
 0x208   :  { %1186 = vmatmul.bf16.gmra.mxu3 %v2326_v0 }
 0x20c   :  { %1157 = vmatmul.bf16.gmra.mxu2 %v2326_v0 }
 0x212   :  { %1104 = vmatmul.bf16.gmra.mxu0 %v2327_v1 }
 0x216   :  { %1133 = vmatmul.bf16.gmra.mxu1 %v2327_v1 }
 0x218   :  { %1191 = vmatmul.bf16.gmra.mxu3 %v2327_v1 }
 0x21c   :  { %1162 = vmatmul.bf16.gmra.mxu2 %v2327_v1 }
 0x222   :  { %1109 = vmatmul.bf16.gmra.mxu0 %v2328_v37 }
 0x226   :  { %1138 = vmatmul.bf16.gmra.mxu1 %v2328_v37 }
 0x228   :  { %1196 = vmatmul.bf16.gmra.mxu3 %v2328_v37 }
 0x22c   :  { %1167 = vmatmul.bf16.gmra.mxu2 %v2328_v37 }
 0x26f   :  { %v1095_v43 = vpop.f32.mrf.mxu0 }
 0x270   :  { %v1096_v24 = vadd.f32 %v1095_v43, %v3082_v10 }
 0x272   :  { %1202 = vst [vmem:[#allocation2] sm:$0xff] %v1096_v24 }
 0x273   :  { %v1124_v26 = vpop.f32.mrf.mxu1 }
 0x274   :  { %v1125_v2 = vadd.f32 %v1124_v26, %v3084_v20 }
 0x276   :  { %1203 = vst [vmem:[#allocation2 + $0x8] sm:$0xff] %v1125_v2 }
 0x277   :  { %v1097_v32 = vpop.f32.mrf.mxu0 }
 0x278   :  { %v1098_v27 = vadd.f32 %v1097_v32, %v3082_v10 }
 0x27a   :  { %1206 = vst [vmem:[#allocation2 + $0x20] sm:$0xff] %v1098_v27 }
 0x27b   :  { %v1182_v25 = vpop.f32.mrf.mxu3  ;;  %v1126_v29 = vpop.f32.mrf.mxu1 }
 0x27c   :  { %v1183_v38 = vadd.f32 %v1182_v25, %v3090_v30  ;;  %v1127_v40 = vadd.f32 %v1126_v29, %v3084_v20 }
 0x27e   :  { %1205 = vst [vmem:[#allocation2 + $0x18] sm:$0xff] %v1183_v38 }
 0x27f   :  { %v1153_v21 = vpop.f32.mrf.mxu2  ;;  %1207 = vst [vmem:[#allocation2 + $0x28] sm:$0xff] %v1127_v40  ;;  %v1100_v35 = vpop.f32.mrf.mxu0 }
 0x280   :  { %v1154_v39 = vadd.f32 %v1153_v21, %v3088_v28  ;;  %v1101_v13 = vadd.f32 %v1100_v35, %v3082_v10 }
 0x282   :  { %1204 = vst [vmem:[#allocation2 + $0x10] sm:$0xff] %v1154_v39 }
 0x283   :  { %v1184_v36 = vpop.f32.mrf.mxu3  ;;  %v1129_v0 = vpop.f32.mrf.mxu1  ;;  %1210 = vst [vmem:[#allocation2 + $0x40] sm:$0xff] %v1101_v13 }
 0x284   :  { %v1185_v1 = vadd.f32 %v1184_v36, %v3090_v30  ;;  %v1130_v37 = vadd.f32 %v1129_v0, %v3084_v20 }
 0x286   :  { %1209 = vst [vmem:[#allocation2 + $0x38] sm:$0xff] %v1185_v1 }
 0x287   :  { %v1155_v7 = vpop.f32.mrf.mxu2  ;;  %1211 = vst [vmem:[#allocation2 + $0x48] sm:$0xff] %v1130_v37  ;;  %v1102_v43 = vpop.f32.mrf.mxu0 }
 0x288   :  { %v1156_v33 = vadd.f32 %v1155_v7, %v3088_v28  ;;  %v1103_v2 = vadd.f32 %v1102_v43, %v3082_v10 }
 0x28a   :  { %1208 = vst [vmem:[#allocation2 + $0x30] sm:$0xff] %v1156_v33 }
 0x28b   :  { %v1187_v26 = vpop.f32.mrf.mxu3  ;;  %v1131_v21 = vpop.f32.mrf.mxu1  ;;  %1214 = vst [vmem:[#allocation2 + $0x60] sm:$0xff] %v1103_v2 }
 0x28c   :  { %v1188_v32 = vadd.f32 %v1187_v26, %v3090_v30  ;;  %v1132_v39 = vadd.f32 %v1131_v21, %v3084_v20 }
 0x28e   :  { %1213 = vst [vmem:[#allocation2 + $0x58] sm:$0xff] %v1188_v32 }
 0x28f   :  { %v1158_v34 = vpop.f32.mrf.mxu2  ;;  %1215 = vst [vmem:[#allocation2 + $0x68] sm:$0xff] %v1132_v39  ;;  %v1105_v27 = vpop.f32.mrf.mxu0 }
 0x290   :  { %v1159_v24 = vadd.f32 %v1158_v34, %v3088_v28  ;;  %v1106_v40 = vadd.f32 %v1105_v27, %v3082_v10 }
 0x292   :  { %1212 = vst [vmem:[#allocation2 + $0x50] sm:$0xff] %v1159_v24 }
 0x293   :  { %v1189_v38 = vpop.f32.mrf.mxu3  ;;  %v1134_v7 = vpop.f32.mrf.mxu1  ;;  %1218 = vst [vmem:[#allocation2 + $0x80] sm:$0xff] %v1106_v40 }
 0x294   :  { %v1190_v35 = vadd.f32 %v1189_v38, %v3090_v30  ;;  %v1135_v33 = vadd.f32 %v1134_v7, %v3084_v20 }
 0x296   :  { %1217 = vst [vmem:[#allocation2 + $0x78] sm:$0xff] %v1190_v35 }
 0x297   :  { %v1160_v25 = vpop.f32.mrf.mxu2  ;;  %1219 = vst [vmem:[#allocation2 + $0x88] sm:$0xff] %v1135_v33  ;;  %v1107_v13 = vpop.f32.mrf.mxu0 }
 0x298   :  { %v1161_v29 = vadd.f32 %v1160_v25, %v3088_v28  ;;  %v1108_v37 = vadd.f32 %v1107_v13, %v3082_v10 }
 0x29a   :  { %1216 = vst [vmem:[#allocation2 + $0x70] sm:$0xff] %v1161_v29 }
 0x29b   :  { %v1192_v1 = vpop.f32.mrf.mxu3  ;;  %v1136_v34 = vpop.f32.mrf.mxu1  ;;  %1222 = vst [vmem:[#allocation2 + $0xa0] sm:$0xff] %v1108_v37 }
 0x29c   :  { %v1193_v43 = vadd.f32 %v1192_v1, %v3090_v30  ;;  %v1137_v24 = vadd.f32 %v1136_v34, %v3084_v20 }
 0x29e   :  { %1221 = vst [vmem:[#allocation2 + $0x98] sm:$0xff] %v1193_v43 }
 0x29f   :  { %v1163_v36 = vpop.f32.mrf.mxu2  ;;  %1223 = vst [vmem:[#allocation2 + $0xa8] sm:$0xff] %v1137_v24  ;;  %v1110_v2 = vpop.f32.mrf.mxu0 }
 0x2a0   :  { %v1164_v0 = vadd.f32 %v1163_v36, %v3088_v28  ;;  %v1111_v39 = vadd.f32 %v1110_v2, %v3082_v10 }
 0x2a2   :  { %1220 = vst [vmem:[#allocation2 + $0x90] sm:$0xff] %v1164_v0 }
 0x2a3   :  { %v1194_v32 = vpop.f32.mrf.mxu3  ;;  %v1139_v25 = vpop.f32.mrf.mxu1  ;;  %1226 = vst [vmem:[#allocation2 + $0xc0] sm:$0xff] %v1111_v39 }
 0x2a4   :  { %v1195_v27 = vadd.f32 %v1194_v32, %v3090_v30  ;;  %v1140_v29 = vadd.f32 %v1139_v25, %v3084_v20 }
 0x2a6   :  { %1225 = vst [vmem:[#allocation2 + $0xb8] sm:$0xff] %v1195_v27 }
 0x2a7   :  { %v1165_v26 = vpop.f32.mrf.mxu2  ;;  %1227 = vst [vmem:[#allocation2 + $0xc8] sm:$0xff] %v1140_v29  ;;  %v1112_v40 = vpop.f32.mrf.mxu0 }
 0x2a8   :  { %v1166_v21 = vadd.f32 %v1165_v26, %v3088_v28  ;;  %v1113_v33 = vadd.f32 %v1112_v40, %v3082_v10 }
 0x2aa   :  { %1224 = vst [vmem:[#allocation2 + $0xb0] sm:$0xff] %v1166_v21 }
 0x2ab   :  { %v1197_v35 = vpop.f32.mrf.mxu3  ;;  %v1141_v36 = vpop.f32.mrf.mxu1  ;;  %1230 = vst [vmem:[#allocation2 + $0xe0] sm:$0xff] %v1113_v33 }
 0x2ac   :  { %v1198_v13 = vadd.f32 %v1197_v35, %v3090_v30  ;;  %v1142_v0 = vadd.f32 %v1141_v36, %v3084_v20 }
 0x2ae   :  { %1229 = vst [vmem:[#allocation2 + $0xd8] sm:$0xff] %v1198_v13 }
 0x2af   :  { %v1168_v38 = vpop.f32.mrf.mxu2  ;;  %1231 = vst [vmem:[#allocation2 + $0xe8] sm:$0xff] %v1142_v0 }
 0x2b0   :  { %v1169_v7 = vadd.f32 %v1168_v38, %v3088_v28 }
 0x2b2   :  { %1228 = vst [vmem:[#allocation2 + $0xd0] sm:$0xff] %v1169_v7 }
 0x2b3   :  { %v1199_v34 = vpop.f32.mrf.mxu3 }
 0x2b4   :  { %v1200_v43 = vadd.f32 %v1199_v34, %v3090_v30 }
 0x2b6   :  { %1233 = vst [vmem:[#allocation2 + $0xf8] sm:$0xff] %v1200_v43 }
 0x2b7   :  { %v1170_v1 = vpop.f32.mrf.mxu2 }
 0x2b8   :  { %v1171_v37 = vadd.f32 %v1170_v1, %v3088_v28 }
 0x2ba   :  { %1232 = vst [vmem:[#allocation2 + $0xf0] sm:$0xff] %v1171_v37 }
 0x2bb LB: > { %v2147_v10 = vor.u32 %v3071_v18, %v3063_v16  ;;  %v2151_v20 = vor.u32 %v3061_v9, %v3069_v19  ;;  %v2155_v28 = vor.u32 %v3075_v4, %v3067_v14  ;;  %v2159_v30 = vor.u32 %v3065_v12, %v3073_v23  ;;  %v3291_v13 = vld [vmem:[#allocation48_spill] sm:$0xff]  ;;  %v3292_v1 = vld [vmem:[#allocation41_spill] sm:$0xff]  ;;  %s2029_s27 = sshll.u32 %s2604_s6, 3  ;;  %s1239_s6 = sadd.s32 1, %s2604_s6   ;;  %s2604_s6 = sphi %s3122_s6, %s1239_s6  }
 0x2bc   : > { %v2131_v24 = vor.u32 %v3055_v5, %v3047_v17  ;;  %v2135_v26 = vor.u32 %v3045_v8, %v3053_v6  ;;  %v2139_v2 = vor.u32 %v3059_v22, %v3051_v15  ;;  %v2143_v21 = vor.u32 %v3049_v11, %v3057_v31  ;;  %v3293_v37 = vld [vmem:[#allocation45_spill] sm:$0xff]  ;;  %v3294_v43 = vld [vmem:[#allocation44_spill] sm:$0xff]  ;;  %s1243_s28 = sshra.s32 %s2029_s27, 3  ;;  %p1236_p1 = scmp.ge.s32.totalorder %s1239_s6, 8  }
 0x2bd   : > { %1413 = vmatpush.bf16.msra.mxu0 %v2147_v10  ;;  %1426 = vmatpush.bf16.msra.mxu1 %v2151_v20  ;;  %v2115_v32 = vor.u32 %v3039_v62, %v3031_v58  ;;  %v2119_v39 = vor.u32 %v3029_v57, %v3037_v61  ;;  %v2123_v25 = vor.u32 %v3043_v3, %v3035_v60  ;;  %v3295_v10 = vld [vmem:[#allocation40_spill] sm:$0xff]  ;;  %s2329_s29 = sshll.u32 %s1243_s28, 5  ;;  %s2618_s11 = smov (%p1236_p1), [#allocation18]  }
 0x2be   : > { %1439 = vmatpush.bf16.msra.mxu2 %v2155_v28  ;;  %1452 = vmatpush.bf16.msra.mxu3 %v2159_v30  ;;  %v2127_v27 = vor.u32 %v3033_v59, %v3041_v63  ;;  %v2099_v29 = vor.u32 %v3023_v54, %v3015_v50  ;;  %v2103_v38 = vor.u32 %v3013_v49, %v3021_v53  ;;  %v3296_v28 = vld [vmem:[#allocation43_spill] sm:$0xff]  ;;  %s1247_s5 = scalar_lea.vmem [#allocation2], %s2329_s29  ;;  %s1578_s0 = sshll.u32 (%p1236_p1), %s2618_s11, 4  ;;  %s1579_s0 = int_to_ptr.vmem [resolvable:$true] %s1578_s0 }
 0x2bf   : > { %v2107_v40 = vor.u32 %v3027_v56, %v3019_v52  ;;  %v2111_v7 = vor.u32 %v3017_v51, %v3025_v55  ;;  %v2083_v35 = vor.u32 %v3007_v46, %v2999_v42  ;;  %v2087_v33 = vor.u32 %v2997_v41, %v3005_v45  ;;  %v3297_v30 = vld [vmem:[#allocation47_spill] sm:$0xff]  ;;  %v2387_v41 = vld [vmem:[%s3209_s8] ss:$0 sm:$0xff] (%p1236_p1)  ;;  %s1580_s14 = sshll.u32 (%p1236_p1), %s3210_s9, 4  ;;  %s1581_s14 = int_to_ptr.hbm [resolvable:$true] %s1580_s14 }
 0x2c0   : > { %v2091_v36 = vor.u32 %v3011_v48, %v3003_v44  ;;  %v2095_v0 = vor.u32 %v3291_v13, %v3009_v47  ;;  %v2067_v34 = vor.u32 %v3293_v37, %v3292_v1  ;;  %v2071_v20 = vor.u32 %v3295_v10, %v3294_v43  ;;  %v3309_v1 = vld [vmem:[#allocation29_spill] sm:$0xff]  ;;  %v3311_v43 = vld [vmem:[#allocation24_spill] sm:$0xff] }
 0x2c1   : > { %1414 = vmatpush.bf16.msra.mxu0 %v2131_v24  ;;  %1427 = vmatpush.bf16.msra.mxu1 %v2135_v26  ;;  %v2075_v24 = vor.u32 %v3297_v30, %v3296_v28  ;;  %v3298_v26 = vld [vmem:[#allocation46_spill] sm:$0xff]  ;;  %v3312_v28 = vld [vmem:[#allocation27_spill] sm:$0xff] }
 0x2c2   : > { %1440 = vmatpush.bf16.msra.mxu2 %v2139_v2  ;;  %1453 = vmatpush.bf16.msra.mxu3 %v2143_v21  ;;  %v3299_v2 = vld [vmem:[#allocation42_spill] sm:$0xff]  ;;  %v3313_v30 = vld [vmem:[#allocation31_spill] sm:$0xff] }
 0x2c3   : > { %v2079_v21 = vor.u32 %v3299_v2, %v3298_v26  ;;  %v3314_v26 = vld [vmem:[#allocation30_spill] sm:$0xff] }
 0x2c4   : > { %v3315_v2 = vld [vmem:[#allocation26_spill] sm:$0xff] }
 0x2c5   : > { %1415 = vmatpush.bf16.msra.mxu0 %v2115_v32  ;;  %1428 = vmatpush.bf16.msra.mxu1 %v2119_v39  ;;  %v3300_v32 = vld [vmem:[#allocation33_spill] sm:$0xff] }
 0x2c6   : > { %1441 = vmatpush.bf16.msra.mxu2 %v2123_v25  ;;  %1454 = vmatpush.bf16.msra.mxu3 %v2127_v27  ;;  %v3301_v39 = vld [vmem:[#allocation37_spill] sm:$0xff]  ;;  %v3302_v27 = vld [vmem:[#allocation36_spill] sm:$0xff] }
 0x2c7   : > { %v2051_v25 = vor.u32 %v3301_v39, %v3300_v32  ;;  %v1248_v39 = vld [vmem:[%s1247_s5] sm:$0xff] }
 0x2c9   : > { %1416 = vmatpush.bf16.msra.mxu0 %v2099_v29  ;;  %1429 = vmatpush.bf16.msra.mxu1 %v2103_v38  ;;  %v3303_v29 = vld [vmem:[#allocation32_spill] sm:$0xff] }
 0x2ca   : > { %1442 = vmatpush.bf16.msra.mxu2 %v2107_v40  ;;  %1455 = vmatpush.bf16.msra.mxu3 %v2111_v7  ;;  %v2055_v38 = vor.u32 %v3303_v29, %v3302_v27  ;;  %v3304_v40 = vld [vmem:[#allocation35_spill] sm:$0xff] }
 0x2cb   : > { %v3305_v7 = vld [vmem:[#allocation39_spill] sm:$0xff] }
 0x2cd   : > { %1417 = vmatpush.bf16.msra.mxu0 %v2083_v35  ;;  %1430 = vmatpush.bf16.msra.mxu1 %v2087_v33  ;;  %v2059_v35 = vor.u32 %v3305_v7, %v3304_v40  ;;  %v3306_v33 = vld [vmem:[#allocation38_spill] sm:$0xff] }
 0x2ce   : > { %1443 = vmatpush.bf16.msra.mxu2 %v2091_v36  ;;  %1456 = vmatpush.bf16.msra.mxu3 %v2095_v0  ;;  %v3307_v36 = vld [vmem:[#allocation34_spill] sm:$0xff]  ;;  %v3308_v0 = vld [vmem:[#allocation25_spill] sm:$0xff] }
 0x2cf   : > { %v2063_v13 = vor.u32 %v3307_v36, %v3306_v33  ;;  %v2035_v37 = vor.u32 %v3309_v1, %v3308_v0  ;;  %v1250_v33 = vld [vmem:[%s1247_s5 + $0x10] sm:$0xff]  ;;  %v1251_v36 = vld [vmem:[%s1247_s5 + $0x18] sm:$0xff] }
 0x2d1   : > { %1418 = vmatpush.bf16.msra.mxu0 %v2067_v34  ;;  %1431 = vmatpush.bf16.msra.mxu1 %v2071_v20  ;;  %v3310_v34 = vld [vmem:[#allocation28_spill] sm:$0xff] }
 0x2d2   : > { %1444 = vmatpush.bf16.msra.mxu2 %v2075_v24  ;;  %1457 = vmatpush.bf16.msra.mxu3 %v2079_v21  ;;  %v2039_v10 = vor.u32 %v3311_v43, %v3310_v34  ;;  %v1241_v20 = vld [vmem:[#allocation4] sm:$0xff]  ;;  %v2043_v24 = vor.u32 %v3313_v30, %v3312_v28  ;;  %v2047_v21 = vor.u32 %v3315_v2, %v3314_v26  ;;  %v1242_v2 = vld [vmem:[#allocation5] sm:$0xff] }
 0x2d3   : > { %v1252_v32 = vpack.c.bf16 %v1241_v20, %v1241_v20 }
 0x2d5   : > { %1419 = vmatpush.bf16.msra.mxu0 %v2051_v25  ;;  %1432 = vmatpush.bf16.msra.mxu1 %v2055_v38  ;;  %v1249_v25 = vld [vmem:[%s1247_s5 + $0x8] sm:$0xff] }
 0x2d6   : > { %1445 = vmatpush.bf16.msra.mxu2 %v2059_v35  ;;  %1458 = vmatpush.bf16.msra.mxu3 %v2063_v13 }
 0x2d9   : > { %1420 = vmatpush.bf16.msra.mxu0 %v2035_v37  ;;  %1433 = vmatpush.bf16.msra.mxu1 %v2039_v10 }
 0x2da   : > { %1446 = vmatpush.bf16.msra.mxu2 %v2043_v24  ;;  %1459 = vmatpush.bf16.msra.mxu3 %v2047_v21 }
 0x2dc   : > { %1421 = vmatmul.bf16.vlgmr.msra.gmra.mxu0 %v1252_v32  ;;  %1434 = vmatmul.bf16.vlgmr.msra.gmra.mxu1 %v1252_v32 }
 0x2dd   : > { %1447 = vmatmul.bf16.vlgmr.msra.gmra.mxu2 %v1252_v32  ;;  %1460 = vmatmul.bf16.vlgmr.msra.gmra.mxu3 %v1252_v32 }
 0x359   : > { %v1422_v27 = vpop.f32.mrf.mxu0  ;;  %v1435_v29 = vpop.f32.mrf.mxu1 }
 0x35a   : > { %v1465_v38 = vadd.f32 %v1422_v27, %v1248_v39  ;;  %v1466_v40 = vadd.f32 %v1435_v29, %v1249_v25 }
 0x35c   : > { %v1469_v7 = vmul.f32 0.5, %v1465_v38  ;;  %v1470_v35 = vmul.f32 0.5, %v1466_v40 }
 0x35e   : > { %2377 = vtanh.f32 %v1469_v7 }
 0x35f   : > { %2379 = vtanh.f32 %v1470_v35 }
 0x360   : > { %v1448_v13 = vpop.f32.mrf.mxu2  ;;  %v1461_v0 = vpop.f32.mrf.mxu3 }
 0x361   : > { %v1467_v1 = vadd.f32 %v1448_v13, %v1250_v33  ;;  %v1468_v37 = vadd.f32 %v1461_v0, %v1251_v36  ;;  %v1424_v34 = vpop.f32.mrf.mxu0  ;;  %v1437_v43 = vpop.f32.mrf.mxu1  ;;  %v2337_v13 = vld [vmem:[#allocation17 + $0x38] sm:$0xff] (%p1236_p1)  ;;  %v2336_v0 = vld [vmem:[#allocation17 + $0x30] sm:$0xff] (%p1236_p1) }
 0x362   :  { %1559 = vmatpush.bf16.msra.mxu0 (%p1236_p1), %v2337_v13  ;;  %v2333_v34 = vld [vmem:[#allocation17 + $0x18] sm:$0xff] (%p1236_p1)  ;;  %v2332_v43 = vld [vmem:[#allocation17 + $0x10] sm:$0xff] (%p1236_p1) }
 0x363   : > { %v1471_v10 = vmul.f32 0.5, %v1467_v1  ;;  %2381 = vtanh.f32 %v1468_v37  ;;  %v2335_v1 = vld [vmem:[#allocation17 + $0x28] sm:$0xff] (%p1236_p1)  ;;  %v2334_v37 = vld [vmem:[#allocation17 + $0x20] sm:$0xff] (%p1236_p1) }
 0x364   : > { %v2378_v20 = vpop.eup %2377 }
 0x365   : > { %v2380_v28 = vpop.eup %2379  ;;  %v1475_v30 = vmul.f32 0.5, %v2378_v20  ;;  %2383 = vtanh.f32 %v1471_v10  ;;  %v2331_v10 = vld [vmem:[#allocation17 + $0x8] sm:$0xff] (%p1236_p1)  ;;  %v2330_v20 = vld [vmem:[#allocation17] sm:$0xff] (%p1236_p1) }
 0x366   : > { %v1476_v24 = vmul.f32 0.5, %v2380_v28  ;;  %1560 = vmatpush.bf16.msra.mxu0 (%p1236_p1), %v2336_v0 }
 0x367   : > { %v1478_v26 = vadd.f32 0.5, %v1475_v30 }
 0x368   : > { %v1479_v21 = vadd.f32 0.5, %v1476_v24  ;;  %v1450_v32 = vpop.f32.mrf.mxu2  ;;  %v1463_v39 = vpop.f32.mrf.mxu3 }
 0x369   : > { %v2382_v25 = vpop.eup %2381 }
 0x36a   : > { %v1482_v27 = vmul.f32 %v1479_v21, %v1242_v2  ;;  %v1483_v29 = vmul.f32 %v2382_v25, %v1478_v26  ;;  %1561 = vmatpush.bf16.msra.mxu0 (%p1236_p1), %v2335_v1 }
 0x36b   : > { %v2384_v38 = vpop.eup %2383 }
 0x36c   : > { %v1484_v40 = vadd.f32 %v1483_v29, %v1482_v27  ;;  %v1477_v7 = vmul.f32 0.5, %v2384_v38 }
 0x36e   : > { %2385 = vtanh.f32 %v1484_v40  ;;  %1488 = vst [vmem:[#allocation5] sm:$0xff] %v1484_v40  ;;  %v1480_v35 = vadd.f32 0.5, %v1477_v7  ;;  %1562 = vmatpush.bf16.msra.mxu0 (%p1236_p1), %v2334_v37 }
 0x372   :  { %1563 = vmatpush.bf16.msra.mxu0 (%p1236_p1), %v2333_v34 }
 0x373   :  { %1238 = sbr.rel (!%p1236_p1) target bundleno = 699 (0x2bb), region = 112 }
 0x374   : > { %v2386_v33 = vpop.eup %2385 }
 0x375   : > { %v1486_v36 = vmul.f32 %v2386_v33, %v1480_v35 }
 0x376   :  { %1564 = vmatpush.bf16.msra.mxu0 (%p1236_p1), %v2332_v43 }
 0x377   : > { %1487 = vst [vmem:[#allocation4] sm:$0xff] %v1486_v36 }
 0x37a   :  { %1565 = vmatpush.bf16.msra.mxu0 %v2331_v10 }
 0x37e   :  { %v1489_v28 = vld [vmem:[#allocation4] sm:$0xff]  ;;  %1566 = vmatpush.bf16.msra.mxu0 %v2330_v20 }
 0x37f   :  { %v1490_v30 = vpack.c.bf16 %v1489_v28, %v1489_v28 }
 0x381   :  { %1567 = vmatmul.bf16.vlgmr.msra.gmra.mxu0 %v1490_v30 }
 0x3fe   :  { %v1568_v42 = vpop.f32.mrf.mxu0 }
 0x3ff   :  { %v1569_v44 = vadd.f32 %v2387_v41, %v1568_v42 }
 0x401   :  { %1572 = vst [vmem:[#allocation18] sm:$0xff] %v1569_v44 }
 0x402   :  { %1583 = dma.vmem_to_hbm [thread:$0]  %s1579_s0, 128, %s1581_s14, [#allocation8]  }
 0x406   :  { %v1570_v45 = vpop.f32.mrf.mxu0 }
 0x407   :  { %2596 = dma.done.wait [#allocation8], 128  }
 0x408   :  { %2597 = vsyncadd [#allocation8], 4294967168 }
 0x409   :  { %1588 = vsyncpa [#allocation7], 1 }
 0x40a   :  { %1589 = vsyncpa [#allocation10], 1 }
 0x40b   :  { %1590 = vsyncpa [#allocation13], 1 }
 0x40c   :  { %1591 = vsyncpa [#allocation16], 1 }
 0x40d   :  { %1592 = vsyncpa [#allocation8], 1 }

</bundles_post_ra>
